<compile_context>
chip_gen: v5e
topology: v5e:2x2
jax: 0.10.0
libtpu: 0.0.40
codegen_flags: <defaults>
</compile_context>

<pallas_src>
import functools
import math

import jax
import jax.numpy as jnp
from jax.experimental import pallas as pl
from jax.experimental.pallas import tpu as pltpu


def _round_up(a, b):
    return (a + b - 1) // b * b


# ---------------------------------------------------------------------------
# Hardware queries (best-effort; conservative fallbacks)
# ---------------------------------------------------------------------------
def _num_tensorcores():
    """TensorCores per chip (2 on v7x, 1 on v5e/v6e)."""
    try:
        info = pltpu.get_tpu_info()
        for name in ("num_tensorcores", "tensorcores_per_chip", "num_cores"):
            v = getattr(info, name, None)
            if v:
                return int(v)
    except Exception:
        pass
    try:
        dev = jax.devices()[0]
        v = getattr(dev, "num_cores", None)
        if v:
            return int(v)
        kind = (getattr(dev, "device_kind", "") or "").lower()
        if "v7" in kind:
            return 2
    except Exception:
        pass
    return 1


def _vmem_capacity_bytes():
    try:
        v = int(pltpu.get_tpu_info().vmem_capacity_bytes)
        if v > 0:
            return v
    except Exception:
        pass
    return 64 << 20  # conservative default = v7x physical VMEM


def _block_spec(shape, index_map, *, buffer_count=None):
    """BlockSpec with optional pipeline depth; silently falls back if the
    pipeline_mode kwarg / pl.Buffered is unavailable in this JAX version."""
    if buffer_count is not None:
        try:
            return pl.BlockSpec(shape, index_map,
                                pipeline_mode=pl.Buffered(buffer_count))
        except (TypeError, AttributeError):
            pass
    return pl.BlockSpec(shape, index_map)


# ---------------------------------------------------------------------------
# Kernels
# ---------------------------------------------------------------------------
def _resnet_block_kernel_shortcut(x_ref, w0_ref, b0_ref, w1_ref, b1_ref,
                                  ws_ref, o_ref, *, precision):
    """out = shortcut(x) + fc_1(relu(fc_0(relu(x))))  (learned shortcut)."""
    x = x_ref[...]                                            # (tm, size_in)
    h = jnp.maximum(x, 0.0)                                   # actvn(x)
    net = jnp.maximum(
        jnp.dot(h, w0_ref[...], precision=precision,
                preferred_element_type=jnp.float32) + b0_ref[...], 0.0)
    dx = jnp.dot(net, w1_ref[...], precision=precision,
                 preferred_element_type=jnp.float32) + b1_ref[...]
    x_s = jnp.dot(x, ws_ref[...], precision=precision,
                  preferred_element_type=jnp.float32)
    o_ref[...] = (x_s + dx).astype(o_ref.dtype)


def _resnet_block_kernel_identity(x_ref, w0_ref, b0_ref, w1_ref, b1_ref,
                                  o_ref, *, precision):
    """Same block with an identity shortcut (size_in == size_out)."""
    x = x_ref[...]
    h = jnp.maximum(x, 0.0)
    net = jnp.maximum(
        jnp.dot(h, w0_ref[...], precision=precision,
                preferred_element_type=jnp.float32) + b0_ref[...], 0.0)
    dx = jnp.dot(net, w1_ref[...], precision=precision,
                 preferred_element_type=jnp.float32) + b1_ref[...]
    o_ref[...] = (x.astype(jnp.float32) + dx).astype(o_ref.dtype)


# ---------------------------------------------------------------------------
# Wrapper
# ---------------------------------------------------------------------------
def resnet_block_fc(x, params, *, tm=1024,
                    precision=jax.lax.Precision.HIGHEST):
    """ResnetBlockFC forward pass.

    x: (..., size_in)
    params: 'w0' (size_in, size_h), 'b0' (size_h,), 'w1' (size_h, size_out),
            'b1' (size_out,), optional 'ws' (size_in, size_out) for the
            learned shortcut.
    tm: requested row tile (rows of the flattened batch per grid step).
    """
    w0, b0 = params["w0"], params["b0"]
    w1, b1 = params["w1"], params["b1"]
    ws = params.get("ws", None)

    size_in, size_h = w0.shape
    size_out = w1.shape[1]
    assert w1.shape[0] == size_h
    assert x.shape[-1] == size_in
    if ws is None:
        assert size_in == size_out, "identity shortcut needs size_in == size_out"
    else:
        assert ws.shape == (size_in, size_out)

    dtype = x.dtype
    itemsize = jnp.dtype(dtype).itemsize
    lead = x.shape[:-1]
    n = math.prod(lead) if lead else 1
    x2 = x.reshape(n, size_in)

    # ---- row tile selection --------------------------------------------
    # Big tiles amortise the ~0.35us per-grid-step overhead.  No padding or
    # output slicing: the partial last block is handled by Pallas.  Only on
    # multi-TensorCore chips (v7x) shrink the tile so every core gets >= 2
    # grid steps (keeps the prefetch/writeback pipeline fed on both cores).
    num_cores = _num_tensorcores()
    tm_eff = min(_round_up(max(tm, 8), 8), _round_up(n, 8))
    if num_cores > 1:
        min_steps = 2 * num_cores
        if pl.cdiv(n, tm_eff) < min_steps and n >= min_steps * 8:
            tm_eff = _round_up(pl.cdiv(n, min_steps), 8)
    grid_m = pl.cdiv(n, tm_eff)

    deep_prefetch = grid_m >= 3
    x_buffers = 3 if deep_prefetch else 2
    x_spec = _block_spec((tm_eff, size_in), lambda i: (i, 0),
                         buffer_count=3 if deep_prefetch else None)
    o_spec = pl.BlockSpec((tm_eff, size_out), lambda i: (i, 0))
    out_shape = jax.ShapeDtypeStruct((n, size_out), dtype)

    # ---- weights (fully resident in VMEM; tiny for FC-ResNet blocks) ----
    if ws is not None:
        weights = (w0, b0.reshape(1, size_h), w1, b1.reshape(1, size_out), ws)
        kernel = functools.partial(_resnet_block_kernel_shortcut,
                                   precision=precision)
        flops = 2 * n * (size_in * size_h + size_h * size_out
                         + size_in * size_out)
    else:
        weights = (w0, b0.reshape(1, size_h), w1, b1.reshape(1, size_out))
        kernel = functools.partial(_resnet_block_kernel_identity,
                                   precision=precision)
        flops = 2 * n * (size_in * size_h + size_h * size_out)

    weight_specs = [pl.BlockSpec(w.shape, lambda i: (0, 0)) for w in weights]

    # ---- scheduler / compiler hints --------------------------------------
    weight_bytes = sum(int(w.size) * jnp.dtype(w.dtype).itemsize
                       for w in weights)
    cost = pl.CostEstimate(
        flops=int(flops), transcendentals=0,
        bytes_accessed=int(n * (size_in + size_out) * itemsize + weight_bytes))

    def _vmem_tile_bytes(shape):
        return _round_up(shape[-2], 8) * _round_up(shape[-1], 128) * itemsize

    vmem_needed = (x_buffers * _vmem_tile_bytes((tm_eff, size_in))
                   + 2 * _vmem_tile_bytes((tm_eff, size_out))
                   + 2 * sum(_vmem_tile_bytes(w.shape) for w in weights)
                   + (1 << 20))                                   # headroom
    cp_kwargs = dict(dimension_semantics=("parallel",))
    if vmem_needed > (16 << 20):
        # Raise the scoped-VMEM limit only when the smallest default (16 MiB
        # on v5e) would not fit; cap at ~80% of this generation's physical
        # VMEM (v5e/v6e: 128 MiB, v7x: 64 MiB) to leave Mosaic scratch room.
        cap = int(0.8 * _vmem_capacity_bytes())
        cp_kwargs["vmem_limit_bytes"] = int(min(cap, 2 * vmem_needed))

    out = pl.pallas_call(
        kernel,
        out_shape=out_shape,
        grid_spec=pltpu.PrefetchScalarGridSpec(
            num_scalar_prefetch=0,
            grid=(grid_m,),
            in_specs=[x_spec] + weight_specs,
            out_specs=o_spec,
        ),
        compiler_params=pltpu.CompilerParams(**cp_kwargs),
        cost_estimate=cost,
    )(x2, *weights)

    return out.reshape(*lead, size_out)


# ---------------------------------------------------------------------------
# Deterministic parameter init (mirrors nn.Linear defaults + zeroed fc_1.weight)
# ---------------------------------------------------------------------------
def init_resnet_block_fc_params(key, size_in, size_out=None, size_h=None,
                                dtype=jnp.float32):
    if size_out is None:
        size_out = size_in
    if size_h is None:
        size_h = min(size_in, size_out)

    k0w, k0b, k1b, ksw = jax.random.split(key, 4)
    bound0 = 1.0 / (size_in ** 0.5)
    bound1 = 1.0 / (size_h ** 0.5)

    params = {
        "w0": jax.random.uniform(k0w, (size_in, size_h), dtype,
                                 minval=-bound0, maxval=bound0),
        "b0": jax.random.uniform(k0b, (size_h,), dtype,
                                 minval=-bound0, maxval=bound0),
        # nn.init.zeros_(self.fc_1.weight)
        "w1": jnp.zeros((size_h, size_out), dtype),
        "b1": jax.random.uniform(k1b, (size_out,), dtype,
                                 minval=-bound1, maxval=bound1),
    }
    if size_in != size_out:
        params["ws"] = jax.random.uniform(ksw, (size_in, size_out), dtype,
                                          minval=-bound0, maxval=bound0)
    return params


def _reference(x, params, precision=jax.lax.Precision.HIGHEST):
    """Plain-JAX reference of the PyTorch forward for verification."""
    h = jnp.maximum(x, 0.0)
    net = jnp.dot(h, params["w0"], precision=precision) + params["b0"]
    dx = jnp.dot(jnp.maximum(net, 0.0), params["w1"],
                 precision=precision) + params["b1"]
    x_s = (jnp.dot(x, params["ws"], precision=precision)
           if "ws" in params else x)
    return x_s + dx


# ---------------------------------------------------------------------------
if __name__ == "__main__":
    key = jax.random.PRNGKey(0)
    kp1, kx1, kw1, kp2, kx2, kw2, kp3, kx3, kw3 = jax.random.split(key, 9)
    atol = rtol = 1e-4  # dots run with precision=HIGHEST

    def check(out, ref, name):
        assert out.shape == ref.shape, (name, out.shape, ref.shape)
        err = float(jnp.max(jnp.abs(out - ref)))
        assert jnp.allclose(out, ref, atol=atol, rtol=rtol), (
            "%s: max abs err %e" % (name, err))

    # --- Test 1: learned shortcut (size_in != size_out) ----------------------
    batch, points, size_in, size_out = 2, 64, 32, 64
    params = init_resnet_block_fc_params(kp1, size_in, size_out)
    # fc_1.weight is zero-initialised in the module; use a non-zero weight so
    # the second matmul path is exercised numerically.
    params["w1"] = 0.05 * jax.random.normal(kw1, params["w1"].shape, jnp.float32)
    x = jax.random.normal(kx1, (batch, points, size_in), dtype=jnp.float32)
    out = jax.block_until_ready(resnet_block_fc(x, params))
    ref = _reference(x.reshape(-1, size_in), params).reshape(
        batch, points, size_out)
    check(out, ref, "learned shortcut")

    # --- Test 2: identity shortcut, ragged N (partial last block) ------------
    batch, points, size_in = 2, 50, 32
    params = init_resnet_block_fc_params(kp2, size_in)
    params["w1"] = 0.05 * jax.random.normal(kw2, params["w1"].shape, jnp.float32)
    x = jax.random.normal(kx2, (batch, points, size_in), dtype=jnp.float32)
    out = jax.block_until_ready(resnet_block_fc(x, params))
    ref = _reference(x.reshape(-1, size_in), params).reshape(
        batch, points, size_in)
    check(out, ref, "identity shortcut")

    # --- Test 3: multi-step grid, Buffered(3) path, ragged last tile ---------
    batch, points, size_in, size_out = 3, 1000, 64, 128
    params = init_resnet_block_fc_params(kp3, size_in, size_out)
    params["w1"] = 0.05 * jax.random.normal(kw3, params["w1"].shape, jnp.float32)
    x = jax.random.normal(kx3, (batch, points, size_in), dtype=jnp.float32)
    out = jax.block_until_ready(resnet_block_fc(x, params))
    ref = _reference(x.reshape(-1, size_in), params).reshape(
        batch, points, size_out)
    check(out, ref, "multi-step grid")

    print("KERNEL_OK")
</pallas_src>

<mosaic_0001>
module attributes {stable_mosaic.version = 11 : i64} {
  func.func @_resnet_block_kernel_shortcut(%arg0: i32, %arg1: memref<128x32xf32, #tpu.memory_space<vmem>>, %arg2: memref<32x32xf32, #tpu.memory_space<vmem>>, %arg3: memref<1x32xf32, #tpu.memory_space<vmem>>, %arg4: memref<32x64xf32, #tpu.memory_space<vmem>>, %arg5: memref<1x64xf32, #tpu.memory_space<vmem>>, %arg6: memref<32x64xf32, #tpu.memory_space<vmem>>, %arg7: memref<128x64xf32, #tpu.memory_space<vmem>>) attributes {dimension_semantics = [#tpu.dimension_semantics<parallel>], iteration_bounds = array<i64: 1>, scalar_prefetch = 0 : i64, scratch_operands = 0 : i64, tpu.core_type = #tpu.core_type<tc>, window_params = [{transform_indices = @transform_0, window_bounds = array<i64: 128, 32>}, {pipeline_mode = #tpu.pipeline_mode<synchronous>, transform_indices = @transform_1, window_bounds = array<i64: 32, 32>}, {pipeline_mode = #tpu.pipeline_mode<synchronous>, transform_indices = @transform_2, window_bounds = array<i64: 1, 32>}, {pipeline_mode = #tpu.pipeline_mode<synchronous>, transform_indices = @transform_3, window_bounds = array<i64: 32, 64>}, {pipeline_mode = #tpu.pipeline_mode<synchronous>, transform_indices = @transform_4, window_bounds = array<i64: 1, 64>}, {pipeline_mode = #tpu.pipeline_mode<synchronous>, transform_indices = @transform_5, window_bounds = array<i64: 32, 64>}, {transform_indices = @transform_6, window_bounds = array<i64: 128, 64>}]} {
    %c0 = arith.constant 0 : index
    %c0_0 = arith.constant 0 : index
    %0 = vector.load %arg1[%c0, %c0_0] : memref<128x32xf32, #tpu.memory_space<vmem>>, vector<128x32xf32>
    %cst = arith.constant 0.000000e+00 : f32
    %1 = vector.broadcast %cst : f32 to vector<128x32xf32>
    %2 = arith.maximumf %0, %1 : vector<128x32xf32>
    %c0_1 = arith.constant 0 : index
    %c0_2 = arith.constant 0 : index
    %3 = vector.load %arg2[%c0_1, %c0_2] : memref<32x32xf32, #tpu.memory_space<vmem>>, vector<32x32xf32>
    %cst_3 = arith.constant dense<0.000000e+00> : vector<128x32xf32>
    %4 = tpu.matmul %2, %3, %cst_3 {dimension_numbers = #tpu.dot_dimension_numbers<[1], [0], [0], [1], [0, 0, 1, 1], [], []>, precision = #tpu.contract_precision<fp32>} : vector<128x32xf32>, vector<32x32xf32>, vector<128x32xf32> -> vector<128x32xf32>
    %c0_4 = arith.constant 0 : index
    %c0_5 = arith.constant 0 : index
    %5 = vector.load %arg3[%c0_4, %c0_5] : memref<1x32xf32, #tpu.memory_space<vmem>>, vector<1x32xf32>
    %6 = vector.broadcast %5 : vector<1x32xf32> to vector<128x32xf32>
    %7 = arith.addf %4, %6 : vector<128x32xf32>
    %cst_6 = arith.constant 0.000000e+00 : f32
    %8 = vector.broadcast %cst_6 : f32 to vector<128x32xf32>
    %9 = arith.maximumf %7, %8 : vector<128x32xf32>
    %c0_7 = arith.constant 0 : index
    %c0_8 = arith.constant 0 : index
    %10 = vector.load %arg4[%c0_7, %c0_8] : memref<32x64xf32, #tpu.memory_space<vmem>>, vector<32x64xf32>
    %cst_9 = arith.constant dense<0.000000e+00> : vector<128x64xf32>
    %11 = tpu.matmul %9, %10, %cst_9 {dimension_numbers = #tpu.dot_dimension_numbers<[1], [0], [0], [1], [0, 0, 1, 1], [], []>, precision = #tpu.contract_precision<fp32>} : vector<128x32xf32>, vector<32x64xf32>, vector<128x64xf32> -> vector<128x64xf32>
    %c0_10 = arith.constant 0 : index
    %c0_11 = arith.constant 0 : index
    %12 = vector.load %arg5[%c0_10, %c0_11] : memref<1x64xf32, #tpu.memory_space<vmem>>, vector<1x64xf32>
    %13 = vector.broadcast %12 : vector<1x64xf32> to vector<128x64xf32>
    %14 = arith.addf %11, %13 : vector<128x64xf32>
    %c0_12 = arith.constant 0 : index
    %c0_13 = arith.constant 0 : index
    %15 = vector.load %arg6[%c0_12, %c0_13] : memref<32x64xf32, #tpu.memory_space<vmem>>, vector<32x64xf32>
    %cst_14 = arith.constant dense<0.000000e+00> : vector<128x64xf32>
    %16 = tpu.matmul %0, %15, %cst_14 {dimension_numbers = #tpu.dot_dimension_numbers<[1], [0], [0], [1], [0, 0, 1, 1], [], []>, precision = #tpu.contract_precision<fp32>} : vector<128x32xf32>, vector<32x64xf32>, vector<128x64xf32> -> vector<128x64xf32>
    %17 = arith.addf %16, %14 : vector<128x64xf32>
    %c0_15 = arith.constant 0 : index
    %c0_16 = arith.constant 0 : index
    %18 = vector.load %arg7[%c0_15, %c0_16] : memref<128x64xf32, #tpu.memory_space<vmem>>, vector<128x64xf32>
    tpu.vector_store %arg7[%c0_15, %c0_16], %17 {strides = array<i32>} : memref<128x64xf32, #tpu.memory_space<vmem>>, vector<128x64xf32>,
    return
  }
  func.func @transform_0(%arg0: i32) -> (i32, i32) {
    %c0_i32 = arith.constant 0 : i32
    %c0_i32_0 = arith.constant 0 : i32
    return %arg0, %c0_i32 : i32, i32
  }
  func.func @transform_1(%arg0: i32) -> (i32, i32) {
    %c0_i32 = arith.constant 0 : i32
    %c0_i32_0 = arith.constant 0 : i32
    %c0_i32_1 = arith.constant 0 : i32
    return %c0_i32, %c0_i32_0 : i32, i32
  }
  func.func @transform_2(%arg0: i32) -> (i32, i32) {
    %c0_i32 = arith.constant 0 : i32
    %c0_i32_0 = arith.constant 0 : i32
    %c0_i32_1 = arith.constant 0 : i32
    return %c0_i32, %c0_i32_0 : i32, i32
  }
  func.func @transform_3(%arg0: i32) -> (i32, i32) {
    %c0_i32 = arith.constant 0 : i32
    %c0_i32_0 = arith.constant 0 : i32
    %c0_i32_1 = arith.constant 0 : i32
    return %c0_i32, %c0_i32_0 : i32, i32
  }
  func.func @transform_4(%arg0: i32) -> (i32, i32) {
    %c0_i32 = arith.constant 0 : i32
    %c0_i32_0 = arith.constant 0 : i32
    %c0_i32_1 = arith.constant 0 : i32
    return %c0_i32, %c0_i32_0 : i32, i32
  }
  func.func @transform_5(%arg0: i32) -> (i32, i32) {
    %c0_i32 = arith.constant 0 : i32
    %c0_i32_0 = arith.constant 0 : i32
    %c0_i32_1 = arith.constant 0 : i32
    return %c0_i32, %c0_i32_0 : i32, i32
  }
  func.func @transform_6(%arg0: i32) -> (i32, i32) {
    %c0_i32 = arith.constant 0 : i32
    %c0_i32_0 = arith.constant 0 : i32
    return %arg0, %c0_i32 : i32, i32
  }
}

</mosaic_0001>

<bundles_post_ra>
// kernel: tpu_custom_call.1
= control target key start
LH: loop header
LB: loop body
LE: loop exit
PB: predicated region body
PF: predicated region fallthrough
CT: control target
= control target key end

     0   :  { %vm63_vm0 = vcmask 261120   ;;  %vm2186_vm1 = vcmask 523264   ;;  %s3447_s1 = inlined_call_operand.vmem [shape: f32[32,32], index: 1, kind: input, shape index: {}]   ;;  %s3448_s0 = inlined_call_operand.vmem [shape: f32[128,32], index: 0, kind: input, shape index: {}]   ;;  %s3449_s2 = inlined_call_operand.vmem [shape: f32[1,32], index: 2, kind: input, shape index: {}]   ;;  %s3450_s3 = inlined_call_operand.vmem [shape: f32[32,64], index: 3, kind: input, shape index: {}]   ;;  %s3451_s5 = inlined_call_operand.vmem [shape: f32[32,64], index: 5, kind: input, shape index: {}]   ;;  %s3452_s4 = inlined_call_operand.vmem [shape: f32[1,64], index: 4, kind: input, shape index: {}]   ;;  %s3453_s6 = inlined_call_operand.vmem [shape: f32[128,64], index: 6, kind: output, shape index: {}]  }
   0x1   :  { %v58_v0 = vld [vmem:[%s3447_s1 + $0x18] sm:$0xff]  ;;  %v57_v1 = vld [vmem:[%s3447_s1 + $0x10] sm:$0xff]  ;;  %v56_v2 = vld [vmem:[%s3447_s1 + $0x8] sm:$0xff] }
   0x2   :  { %v2277_v3 = vand.u32 4294901760, %v58_v0  ;;  %v2279_v4 = vand.u32 4294901760, %v57_v1  ;;  %v2281_v5 = vand.u32 4294901760, %v56_v2  ;;  %v55_v6 = vld [vmem:[%s3447_s1] sm:$0xff]  ;;  %v32_v8 = vld [vmem:[%s3448_s0 + $0x48] sm:$0xff]  ;;  %v33_v31 = vld [vmem:[%s3448_s0 + $0x50] sm:$0xff] }
   0x3   :  { %v31_v7 = vld [vmem:[%s3448_s0 + $0x40] sm:$0xff]  ;;  %v2292_v9 = vand.u32 4294901760, %v55_v6  ;;  %v48_v11 = vmax.f32 %v32_v8, 0.0  ;;  %v24_v34 = vld [vmem:[%s3448_s0 + $0x8] sm:$0xff]  ;;  %v25_v35 = vld [vmem:[%s3448_s0 + $0x10] sm:$0xff]  ;;  %v49_v43 = vmax.f32 %v33_v31, 0.0 }
   0x4   :  { %v47_v10 = vmax.f32 %v31_v7, 0.0  ;;  %v23_v12 = vld [vmem:[%s3448_s0] sm:$0xff]  ;;  %2207 = vmatpush.msra.mxu2 %v2277_v3  ;;  %v274_v13 = vsub.f32 %v58_v0, %v2277_v3  ;;  %v280_v14 = vsub.f32 %v57_v1, %v2279_v4  ;;  %v2301_v15 = vsub.f32 %v56_v2, %v2281_v5  ;;  %125 = vmatpush.msra.mxu0 %v2277_v3  ;;  %v34_v40 = vld [vmem:[%s3448_s0 + $0x58] sm:$0xff]  ;;  %v28_v31 = vld [vmem:[%s3448_s0 + $0x28] sm:$0xff] }
   0x5   :  { %v39_v16 = vmax.f32 %v23_v12, 0.0  ;;  %v2306_v18 = vsub.f32 %v55_v6, %v2292_v9  ;;  %v92_v19 = vsel %vm63_vm0, %v48_v11, 0  ;;  %v40_v46 = vmax.f32 %v24_v34, 0.0  ;;  %v26_v51 = vld [vmem:[%s3448_s0 + $0x18] sm:$0xff]  ;;  %v35_v2 = vld [vmem:[%s3448_s0 + $0x60] sm:$0xff] }
   0x6   :  { %v89_v17 = vsel %vm63_vm0, %v47_v10, 0  ;;  %2208 = vmatpush.msra.mxu2 %v2279_v4  ;;  %v275_v20 = vand.u32 4294901760, %v274_v13  ;;  %v281_v21 = vand.u32 4294901760, %v280_v14  ;;  %v287_v23 = vand.u32 4294901760, %v2301_v15  ;;  %127 = vmatpush.msra.mxu0 %v2279_v4 }
   0x7   :  { %v2310_v22 = vand.u32 4294901760, %v89_v17  ;;  %v293_v24 = vand.u32 4294901760, %v2306_v18  ;;  %v2315_v25 = vand.u32 4294901760, %v92_v19  ;;  %v65_v26 = vsel %vm63_vm0, %v39_v16, 0 }
   0x8   :  { %2209 = vmatpush.msra.mxu2 %v2281_v5  ;;  %v276_v27 = vsub.f32 %v274_v13, %v275_v20  ;;  %v282_v28 = vsub.f32 %v280_v14, %v281_v21  ;;  %v288_v30 = vsub.f32 %v2301_v15, %v287_v23  ;;  %129 = vmatpush.msra.mxu0 %v2281_v5  ;;  %v2330_v33 = vand.u32 4294901760, %v65_v26 }
   0x9   :  { %v2320_v29 = vsub.f32 %v89_v17, %v2310_v22  ;;  %v2327_v32 = vsub.f32 %v92_v19, %v2315_v25  ;;  %v294_v39 = vsub.f32 %v2306_v18, %v293_v24  ;;  %v41_v47 = vmax.f32 %v25_v35, 0.0 }
   0xa   :  { %v277_v36 = vand.u32 4294901760, %v276_v27  ;;  %2210 = vmatpush.msra.mxu2 %v2292_v9  ;;  %v283_v37 = vand.u32 4294901760, %v282_v28  ;;  %v289_v41 = vand.u32 4294901760, %v288_v30  ;;  %131 = vmatpush.msra.mxu0 %v2292_v9  ;;  %v2348_v42 = vsub.f32 %v65_v26, %v2330_v33 }
   0xb   :  { %v198_v38 = vand.u32 4294901760, %v2320_v29  ;;  %v206_v45 = vand.u32 4294901760, %v2327_v32  ;;  %v95_v49 = vsel %vm63_vm0, %v49_v43, 0  ;;  %v50_v50 = vmax.f32 %v34_v40, 0.0 }
   0xc   :  { %376 = vmatpush.msrb.mxu2 %v274_v13  ;;  %2211 = vmatpush.msra.mxu3 %v277_v36  ;;  %v134_v48 = vand.u32 4294901760, %v2348_v42  ;;  %v295_v53 = vand.u32 4294901760, %v294_v39  ;;  %v2359_v54 = vand.u32 4294901760, %v95_v49  ;;  %v68_v55 = vsel %vm63_vm0, %v40_v46, 0 }
   0xd   :  { %v199_v44 = vsub.f32 %v2320_v29, %v198_v38  ;;  %278 = vmatpush.msra.mxu1 %v277_v36  ;;  %599 = vmatpush.msrb.mxu0 %v275_v20  ;;  %v2365_v57 = vand.u32 4294901760, %v68_v55  ;;  %v207_v58 = vsub.f32 %v2327_v32, %v206_v45  ;;  %v71_v60 = vsel %vm63_vm0, %v41_v47, 0 }
   0xe   :  { %379 = vmatpush.msrb.mxu2 %v280_v14  ;;  %2212 = vmatpush.msra.mxu3 %v283_v37  ;;  %v135_v56 = vsub.f32 %v2348_v42, %v134_v48  ;;  %v2372_v59 = vsub.f32 %v95_v49, %v2359_v54  ;;  %v42_v61 = vmax.f32 %v26_v51, 0.0  ;;  %v98_v0 = vsel %vm63_vm0, %v50_v50, 0 }
   0xf   :  { %v200_v52 = vand.u32 4294901760, %v199_v44  ;;  %284 = vmatpush.msra.mxu1 %v283_v37  ;;  %603 = vmatpush.msrb.mxu0 %v281_v21  ;;  %v2376_v63 = vsub.f32 %v68_v55, %v2365_v57  ;;  %v2379_v1 = vand.u32 4294901760, %v71_v60  ;;  %v208_v8 = vand.u32 4294901760, %v207_v58 }
  0x10   :  { %382 = vmatpush.msrb.mxu2 %v2301_v15  ;;  %2213 = vmatpush.msra.mxu3 %v289_v41  ;;  %v136_v62 = vand.u32 4294901760, %v135_v56  ;;  %v214_v10 = vand.u32 4294901760, %v2372_v59  ;;  %v2392_v11 = vand.u32 4294901760, %v98_v0  ;;  %v74_v12 = vsel %vm63_vm0, %v42_v61, 0  ;;  %v27_v15 = vld [vmem:[%s3448_s0 + $0x20] sm:$0xff] }
  0x11   :  { %201 = vmatmul.f32.vlgmr.msra.gmra.mxu2 %v200_v52  ;;  %290 = vmatpush.msra.mxu1 %v289_v41  ;;  %v142_v6 = vand.u32 4294901760, %v2376_v63  ;;  %v2388_v7 = vsub.f32 %v71_v60, %v2379_v1  ;;  %v51_v14 = vmax.f32 %v35_v2, 0.0  ;;  %v2407_v19 = vand.u32 4294901760, %v74_v12  ;;  %v37_v41 = vld [vmem:[%s3448_s0 + $0x70] sm:$0xff] }
  0x12   :  { %607 = vmatpush.msrb.mxu0 %v287_v23  ;;  %2214 = vmatpush.msra.mxu3 %v295_v53  ;;  %v215_v20 = vsub.f32 %v2372_v59, %v214_v10  ;;  %v2413_v21 = vsub.f32 %v98_v0, %v2392_v11  ;;  %v36_v23 = vld [vmem:[%s3448_s0 + $0x68] sm:$0xff]  ;;  %v53_v51 = vmax.f32 %v37_v41, 0.0  ;;  %v29_v52 = vld [vmem:[%s3448_s0 + $0x30] sm:$0xff]  ;;  %v38_v0 = vld [vmem:[%s3448_s0 + $0x78] sm:$0xff] }
  0x13   :  { %385 = vmatpush.msrb.mxu2 %v2306_v18  ;;  %330 = vmatmul.f32.vlgmr.msra.gmra.mxu3 %v2310_v22  ;;  %v143_v13 = vsub.f32 %v2376_v63, %v142_v6  ;;  %v150_v17 = vand.u32 4294901760, %v2388_v7  ;;  %v43_v18 = vmax.f32 %v27_v15, 0.0  ;;  %v45_v61 = vmax.f32 %v29_v52, 0.0 }
  0x14   :  { %137 = vmatmul.f32.vlgmr.msra.gmra.mxu0 %v136_v62  ;;  %480 = vmatpush.msrb.mxu3 %v2277_v3  ;;  %v216_v26 = vand.u32 4294901760, %v215_v20  ;;  %v222_v27 = vand.u32 4294901760, %v2413_v21  ;;  %v107_v62 = vsel %vm63_vm0, %v53_v51, 0  ;;  %v30_v20 = vld [vmem:[%s3448_s0 + $0x38] sm:$0xff] }
  0x15   :  { %296 = vmatpush.msra.mxu1 %v295_v53  ;;  %611 = vmatpush.msrb.mxu0 %v293_v24  ;;  %v144_v16 = vand.u32 4294901760, %v143_v13  ;;  %v151_v24 = vsub.f32 %v2388_v7, %v150_v17  ;;  %v77_v30 = vsel %vm63_vm0, %v43_v18, 0  ;;  %v83_v15 = vsel %vm63_vm0, %v45_v61, 0 }
  0x16   :  { %298 = vmatmul.f32.vlgmr.msra.gmra.mxu1 %v2330_v33  ;;  %482 = vmatpush.msrb.mxu3 %v2279_v4  ;;  %v2440_v36 = vand.u32 4294901760, %v77_v30  ;;  %v223_v37 = vsub.f32 %v2413_v21, %v222_v27 }
  0x17   :  { %690 = vmatpush.msrb.mxu1 %v2277_v3  ;;  %v101_v3 = vsel %vm63_vm0, %v51_v14, 0  ;;  %v152_v34 = vand.u32 4294901760, %v151_v24  ;;  %v2488_v14 = vand.u32 4294901760, %v107_v62 }
  0x18   :  { %484 = vmatpush.msrb.mxu3 %v2281_v5  ;;  %v2430_v28 = vand.u32 4294901760, %v101_v3  ;;  %v2457_v44 = vsub.f32 %v77_v30, %v2440_v36  ;;  %v224_v46 = vand.u32 4294901760, %v223_v37  ;;  %v46_v30 = vmax.f32 %v30_v20, 0.0 }
  0x19   :  { %209 = vmatmul.f32.gmra.mxu2 %v208_v8  ;;  %692 = vmatpush.msrb.mxu1 %v2279_v4  ;;  %v2427_v4 = vsub.f32 %v74_v12, %v2407_v19 }
  0x1a   :  { %486 = vmatpush.msrb.mxu3 %v2292_v9  ;;  %v2446_v39 = vsub.f32 %v101_v3, %v2430_v28  ;;  %v166_v55 = vand.u32 4294901760, %v2457_v44  ;;  %v86_v41 = vsel %vm63_vm0, %v46_v30, 0 }
  0x1b   :  { %694 = vmatpush.msrb.mxu1 %v2281_v5  ;;  %334 = vmatmul.f32.gmra.mxu3 %v2315_v25  ;;  %v52_v5 = vmax.f32 %v36_v23, 0.0  ;;  %v158_v35 = vand.u32 4294901760, %v2427_v4  ;;  %v2496_v23 = vand.u32 4294901760, %v83_v15 }
  0x1c   :  { %145 = vmatmul.f32.gmra.mxu0 %v144_v16  ;;  %v230_v47 = vand.u32 4294901760, %v2446_v39  ;;  %v167_v2 = vsub.f32 %v2457_v44, %v166_v55  ;;  %v54_v16 = vmax.f32 %v38_v0, 0.0 }
  0x1d   :  { %696 = vmatpush.msrb.mxu1 %v2292_v9  ;;  %v44_v9 = vmax.f32 %v28_v31, 0.0  ;;  %v104_v40 = vsel %vm63_vm0, %v52_v5, 0  ;;  %v159_v43 = vsub.f32 %v2427_v4, %v158_v35 }
  0x1e   :  { %302 = vmatmul.f32.gmra.mxu1 %v2365_v57  ;;  %v2460_v49 = vand.u32 4294901760, %v104_v40  ;;  %v231_v58 = vsub.f32 %v2446_v39, %v230_v47  ;;  %v168_v18 = vand.u32 4294901760, %v167_v2  ;;  %v110_v5 = vsel %vm63_vm0, %v54_v16, 0 }
  0x1f   :  { %v80_v50 = vsel %vm63_vm0, %v44_v9, 0  ;;  %v160_v53 = vand.u32 4294901760, %v159_v43 }
  0x20   :  { %v2468_v56 = vand.u32 4294901760, %v80_v50  ;;  %v2474_v60 = vsub.f32 %v104_v40, %v2460_v49  ;;  %v232_v12 = vand.u32 4294901760, %v231_v58  ;;  %v2513_v40 = vand.u32 4294901760, %v110_v5 }
  0x21   :  { %217 = vmatmul.f32.gmra.mxu2 %v216_v26  ;;  %v2502_v26 = vsub.f32 %v107_v62, %v2488_v14 }
  0x22   :  { %v2485_v8 = vsub.f32 %v80_v50, %v2468_v56  ;;  %v238_v13 = vand.u32 4294901760, %v2474_v60  ;;  %v2518_v50 = vand.u32 4294901760, %v86_v41  ;;  %v2524_v52 = vsub.f32 %v110_v5, %v2513_v40 }
  0x23   :  { %338 = vmatmul.f32.gmra.mxu3 %v2359_v54  ;;  %v246_v9 = vand.u32 4294901760, %v2502_v26 }
  0x24   :  { %153 = vmatmul.f32.gmra.mxu0 %v152_v34  ;;  %v174_v3 = vand.u32 4294901760, %v2485_v8  ;;  %v239_v24 = vsub.f32 %v2474_v60, %v238_v13  ;;  %v2510_v34 = vsub.f32 %v83_v15, %v2496_v23  ;;  %v2531_v58 = vsub.f32 %v86_v41, %v2518_v50 }
  0x25   :  { %v247_v51 = vsub.f32 %v2502_v26, %v246_v9  ;;  %v254_v62 = vand.u32 4294901760, %v2524_v52 }
  0x26   :  { %306 = vmatmul.f32.gmra.mxu1 %v2379_v1  ;;  %v175_v31 = vsub.f32 %v2485_v8, %v174_v3  ;;  %v240_v37 = vand.u32 4294901760, %v239_v24  ;;  %v190_v2 = vand.u32 4294901760, %v2531_v58 }
  0x27   :  { %v248_v61 = vand.u32 4294901760, %v247_v51 }
  0x28   :  { %v176_v43 = vand.u32 4294901760, %v175_v31  ;;  %v191_v15 = vsub.f32 %v2531_v58, %v190_v2 }
  0x29   :  { %225 = vmatmul.f32.gmra.mxu2 %v224_v46  ;;  %v182_v46 = vand.u32 4294901760, %v2510_v34 }
  0x2a   :  { %v192_v20 = vand.u32 4294901760, %v191_v15 }
  0x2b   :  { %342 = vmatmul.f32.gmra.mxu3 %v2392_v11 }
  0x2c   :  { %161 = vmatmul.f32.gmra.mxu0 %v160_v53  ;;  %v183_v53 = vsub.f32 %v2510_v34, %v182_v46 }
  0x2e   :  { %310 = vmatmul.f32.gmra.mxu1 %v2407_v19  ;;  %v184_v0 = vand.u32 4294901760, %v183_v53 }
  0x31   :  { %233 = vmatmul.f32.gmra.mxu2 %v232_v12  ;;  %v255_v12 = vsub.f32 %v2524_v52, %v254_v62 }
  0x33   :  { %346 = vmatmul.f32.gmra.mxu3 %v2430_v28  ;;  %v256_v16 = vand.u32 4294901760, %v255_v12 }
  0x34   :  { %169 = vmatmul.f32.gmra.mxu0 %v168_v18  ;;  %v781_v18 = vld [vmem:[%s3450_s3 + $0x18] sm:$0xff] }
  0x35   :  { %v2545_v24 = vand.u32 4294901760, %v781_v18 }
  0x36   :  { %314 = vmatmul.f32.gmra.mxu1 %v2440_v36 }
  0x37   :  { %v2549_v30 = vsub.f32 %v781_v18, %v2545_v24  ;;  %847 = vmatpush.msra.mxu2 %v2545_v24  ;;  %1202 = vmatpush.msra.mxu1 %v2545_v24 }
  0x39   :  { %241 = vmatmul.f32.gmra.mxu2 %v240_v37  ;;  %v997_v5 = vand.u32 4294901760, %v2549_v30  ;;  %1098 = vmatpush.msra.mxu0 %v2549_v30 }
  0x3b   :  { %350 = vmatmul.f32.gmra.mxu3 %v2460_v49  ;;  %v998_v31 = vsub.f32 %v2549_v30, %v997_v5 }
  0x3c   :  { %177 = vmatmul.f32.gmra.mxu0 %v176_v43 }
  0x3d   :  { %v999_v37 = vand.u32 4294901760, %v998_v31 }
  0x3e   :  { %318 = vmatmul.f32.gmra.mxu1 %v2468_v56 }
  0x3f   :  { %1000 = vmatpush.msra.mxu3 %v999_v37 }
  0x41   :  { %249 = vmatmul.f32.gmra.mxu2 %v248_v61 }
  0x43   :  { %354 = vmatmul.f32.gmra.mxu3 %v2488_v14 }
  0x44   :  { %185 = vmatmul.f32.gmra.mxu0 %v184_v0 }
  0x46   :  { %322 = vmatmul.f32.gmra.mxu1 %v2496_v23 }
  0x49   :  { %257 = vmatmul.f32.gmra.mxu2 %v256_v16 }
  0x4b   :  { %358 = vmatmul.f32.gmra.mxu3 %v2513_v40 }
  0x4c   :  { %193 = vmatmul.f32.gmra.mxu0 %v192_v20 }
  0x4e   :  { %326 = vmatmul.f32.gmra.mxu1 %v2518_v50 }
  0x51   :  { %388 = vmatmul.f32.vlgmr.msrb.gmra.mxu2 %v2348_v42 }
  0x53   :  { %490 = vmatmul.f32.vlgmr.msrb.gmra.mxu3 %v134_v48 }
  0x54   :  { %613 = vmatmul.f32.vlgmr.msrb.gmra.mxu0 %v2330_v33 }
  0x56   :  { %698 = vmatmul.f32.vlgmr.msrb.gmra.mxu1 %v2330_v33  ;;  %v780_v33 = vld [vmem:[%s3450_s3 + $0x10] sm:$0xff] }
  0x57   :  { %v2578_v42 = vand.u32 4294901760, %v780_v33 }
  0x59   :  { %393 = vmatmul.f32.gmra.mxu2 %v2376_v63  ;;  %v2584_v48 = vsub.f32 %v780_v33, %v2578_v42  ;;  %1204 = vmatpush.msra.mxu1 %v2578_v42 }
  0x5a   :  { %849 = vmatpush.msra.mxu2 %v2578_v42 }
  0x5b   :  { %496 = vmatmul.f32.gmra.mxu3 %v142_v6  ;;  %1101 = vmatpush.msra.mxu0 %v2584_v48  ;;  %v779_v6 = vld [vmem:[%s3450_s3 + $0x8] sm:$0xff] }
  0x5c   :  { %617 = vmatmul.f32.gmra.mxu0 %v2365_v57 }
  0x5e   :  { %702 = vmatmul.f32.gmra.mxu1 %v2365_v57  ;;  %v1003_v57 = vand.u32 4294901760, %v2584_v48 }
  0x60   :  { %v1004_v63 = vsub.f32 %v2584_v48, %v1003_v57 }
  0x61   :  { %398 = vmatmul.f32.gmra.mxu2 %v2388_v7  ;;  %v2615_v7 = vand.u32 4294901760, %v779_v6 }
  0x63   :  { %502 = vmatmul.f32.gmra.mxu3 %v150_v17  ;;  %851 = vmatpush.msra.mxu2 %v2615_v7  ;;  %v1008_v17 = vsub.f32 %v779_v6, %v2615_v7 }
  0x64   :  { %621 = vmatmul.f32.gmra.mxu0 %v2379_v1  ;;  %1206 = vmatpush.msra.mxu1 %v2615_v7 }
  0x65   :  { %1104 = vmatpush.msra.mxu0 %v1008_v17 }
  0x66   :  { %706 = vmatmul.f32.gmra.mxu1 %v2379_v1  ;;  %v1005_v1 = vand.u32 4294901760, %v1004_v63 }
  0x68   :  { %1006 = vmatpush.msra.mxu3 %v1005_v1 }
  0x69   :  { %403 = vmatmul.f32.gmra.mxu2 %v2427_v4  ;;  %v1009_v4 = vand.u32 4294901760, %v1008_v17 }
  0x6b   :  { %508 = vmatmul.f32.gmra.mxu3 %v158_v35 }
  0x6c   :  { %625 = vmatmul.f32.gmra.mxu0 %v2407_v19 }
  0x6e   :  { %710 = vmatmul.f32.gmra.mxu1 %v2407_v19 }
  0x71   :  { %408 = vmatmul.f32.gmra.mxu2 %v2457_v44  ;;  %v1010_v44 = vsub.f32 %v1008_v17, %v1009_v4 }
  0x73   :  { %514 = vmatmul.f32.gmra.mxu3 %v166_v55  ;;  %v1011_v55 = vand.u32 4294901760, %v1010_v44 }
  0x74   :  { %629 = vmatmul.f32.gmra.mxu0 %v2440_v36 }
  0x75   :  { %1012 = vmatpush.msra.mxu3 %v1011_v55 }
  0x76   :  { %714 = vmatmul.f32.gmra.mxu1 %v2440_v36 }
  0x79   :  { %413 = vmatmul.f32.gmra.mxu2 %v2485_v8 }
  0x7b   :  { %520 = vmatmul.f32.gmra.mxu3 %v174_v3 }
  0x7c   :  { %633 = vmatmul.f32.gmra.mxu0 %v2468_v56 }
  0x7e   :  { %718 = vmatmul.f32.gmra.mxu1 %v2468_v56 }
  0x81   :  { %418 = vmatmul.f32.gmra.mxu2 %v2510_v34 }
  0x83   :  { %526 = vmatmul.f32.gmra.mxu3 %v182_v46 }
  0x84   :  { %637 = vmatmul.f32.gmra.mxu0 %v2496_v23 }
  0x86   :  { %722 = vmatmul.f32.gmra.mxu1 %v2496_v23 }
  0x89   :  { %423 = vmatmul.f32.gmra.mxu2 %v2531_v58 }
  0x8b   :  { %532 = vmatmul.f32.gmra.mxu3 %v190_v2 }
  0x8c   :  { %641 = vmatmul.f32.gmra.mxu0 %v2518_v50 }
  0x8e   :  { %726 = vmatmul.f32.gmra.mxu1 %v2518_v50 }
  0x91   :  { %428 = vmatmul.f32.gmra.mxu2 %v2320_v29  ;;  %v2621_v19 = vpop.f32.mrf.mxu0 }
  0x93   :  { %v2623_v35 = vpop.f32.mrf.mxu1  ;;  %538 = vmatmul.f32.gmra.mxu3 %v198_v38 }
  0x94   :  { %v2625_v36 = vpop.f32.mrf.mxu2  ;;  %645 = vmatmul.f32.gmra.mxu0 %v2310_v22 }
  0x96   :  { %730 = vmatmul.f32.gmra.mxu1 %v2310_v22  ;;  %v2631_v56 = vpop.f32.mrf.mxu3 }
  0x99   :  { %433 = vmatmul.f32.gmra.mxu2 %v2327_v32  ;;  %v2634_v8 = vpop.f32.mrf.mxu0 }
  0x9b   :  { %v2636_v3 = vpop.f32.mrf.mxu1  ;;  %544 = vmatmul.f32.gmra.mxu3 %v206_v45 }
  0x9c   :  { %v2638_v23 = vpop.f32.mrf.mxu2  ;;  %649 = vmatmul.f32.gmra.mxu0 %v2315_v25 }
  0x9e   :  { %734 = vmatmul.f32.gmra.mxu1 %v2315_v25  ;;  %v2644_v22 = vpop.f32.mrf.mxu3 }
  0xa1   :  { %438 = vmatmul.f32.gmra.mxu2 %v2372_v59  ;;  %v2647_v29 = vpop.f32.mrf.mxu0  ;;  %v778_v59 = vld [vmem:[%s3450_s3] sm:$0xff] }
  0xa3   :  { %v2649_v38 = vpop.f32.mrf.mxu1  ;;  %550 = vmatmul.f32.gmra.mxu3 %v214_v10 }
  0xa4   :  { %v2651_v34 = vpop.f32.mrf.mxu2  ;;  %653 = vmatmul.f32.gmra.mxu0 %v2359_v54 }
  0xa6   :  { %738 = vmatmul.f32.gmra.mxu1 %v2359_v54  ;;  %v2657_v32 = vpop.f32.mrf.mxu3  ;;  %v852_v54 = vand.u32 4294901760, %v778_v59 }
  0xa8   :  { %853 = vmatpush.msra.mxu2 %v852_v54  ;;  %v1014_v43 = vsub.f32 %v778_v59, %v852_v54  ;;  %1208 = vmatpush.msra.mxu1 %v852_v54 }
  0xa9   :  { %443 = vmatmul.f32.gmra.mxu2 %v2413_v21  ;;  %v2660_v25 = vpop.f32.mrf.mxu0 }
  0xaa   :  { %v1015_v21 = vand.u32 4294901760, %v1014_v43  ;;  %1107 = vmatpush.msra.mxu0 %v1014_v43  ;;  %1321 = vmatpush.msrb.mxu2 %v997_v5 }
  0xab   :  { %v2662_v45 = vpop.f32.mrf.mxu1  ;;  %556 = vmatmul.f32.gmra.mxu3 %v222_v27 }
  0xac   :  { %v2664_v41 = vpop.f32.mrf.mxu2  ;;  %657 = vmatmul.f32.gmra.mxu0 %v2392_v11  ;;  %1325 = vmatpush.msrb.mxu2 %v1003_v57 }
  0xae   :  { %742 = vmatmul.f32.gmra.mxu1 %v2392_v11  ;;  %v2673_v10 = vpop.f32.mrf.mxu3  ;;  %v1016_v11 = vsub.f32 %v1014_v43, %v1015_v21  ;;  %1329 = vmatpush.msrb.mxu2 %v1009_v4 }
  0xb0   :  { %v1017_v51 = vand.u32 4294901760, %v1016_v11  ;;  %1333 = vmatpush.msrb.mxu2 %v1015_v21 }
  0xb1   :  { %448 = vmatmul.f32.gmra.mxu2 %v2446_v39  ;;  %v2676_v46 = vpop.f32.mrf.mxu0 }
  0xb2   :  { %1018 = vmatpush.msra.mxu3 %v1017_v51 }
  0xb3   :  { %v2680_v27 = vpop.f32.mrf.mxu1  ;;  %562 = vmatmul.f32.gmra.mxu3 %v230_v47 }
  0xb4   :  { %v2682_v50 = vpop.f32.mrf.mxu2  ;;  %661 = vmatmul.f32.gmra.mxu0 %v2430_v28  ;;  %1412 = vmatpush.msrb.mxu3 %v2545_v24 }
  0xb6   :  { %746 = vmatmul.f32.gmra.mxu1 %v2430_v28  ;;  %v2690_v53 = vpop.f32.mrf.mxu3  ;;  %1414 = vmatpush.msrb.mxu3 %v2578_v42 }
  0xb8   :  { %1416 = vmatpush.msrb.mxu3 %v2615_v7 }
  0xb9   :  { %453 = vmatmul.f32.gmra.mxu2 %v2474_v60  ;;  %v2693_v58 = vpop.f32.mrf.mxu0 }
  0xba   :  { %1418 = vmatpush.msrb.mxu3 %v852_v54 }
  0xbb   :  { %v2696_v39 = vpop.f32.mrf.mxu1  ;;  %568 = vmatmul.f32.gmra.mxu3 %v238_v13 }
  0xbc   :  { %v2699_v47 = vpop.f32.mrf.mxu2  ;;  %665 = vmatmul.f32.gmra.mxu0 %v2460_v49 }
  0xbe   :  { %750 = vmatmul.f32.gmra.mxu1 %v2460_v49  ;;  %v2706_v28 = vpop.f32.mrf.mxu3 }
  0xc1   :  { %458 = vmatmul.f32.gmra.mxu2 %v2502_v26  ;;  %v2709_v61 = vpop.f32.mrf.mxu0  ;;  %v2734_v26 = vld [vmem:[%s3449_s2] ss:$0 sm:$0xff] }
  0xc2   :  { %v147_v24 = vadd.f32 %v2734_v26, %v2634_v8 }
  0xc3   :  { %v2711_v0 = vpop.f32.mrf.mxu1  ;;  %574 = vmatmul.f32.gmra.mxu3 %v246_v9  ;;  %v139_v9 = vadd.f32 %v2734_v26, %v2621_v19  ;;  %v155_v19 = vadd.f32 %v2734_v26, %v2647_v29 }
  0xc4   :  { %v2713_v2 = vpop.f32.mrf.mxu2  ;;  %669 = vmatmul.f32.gmra.mxu0 %v2488_v14  ;;  %v304_v42 = vadd.f32 %v2636_v3, %v147_v24 }
  0xc5   :  { %v300_v20 = vadd.f32 %v2623_v35, %v139_v9  ;;  %v308_v21 = vadd.f32 %v2649_v38, %v155_v19  ;;  %v171_v19 = vadd.f32 %v2734_v26, %v2676_v46 }
  0xc6   :  { %754 = vmatmul.f32.gmra.mxu1 %v2488_v14  ;;  %v2719_v60 = vpop.f32.mrf.mxu3 }
  0xc9   :  { %463 = vmatmul.f32.gmra.mxu2 %v2524_v52  ;;  %v2722_v49 = vpop.f32.mrf.mxu0 }
  0xcb   :  { %v2724_v13 = vpop.f32.mrf.mxu1  ;;  %580 = vmatmul.f32.gmra.mxu3 %v254_v62 }
  0xcc   :  { %v2726_v12 = vpop.f32.mrf.mxu2  ;;  %673 = vmatmul.f32.gmra.mxu0 %v2513_v40 }
  0xce   :  { %758 = vmatmul.f32.gmra.mxu1 %v2513_v40  ;;  %v2737_v14 = vpop.f32.mrf.mxu3  ;;  %v1487_v40 = vld [vmem:[%s3451_s5 + $0x18] sm:$0xff] }
  0xcf   :  { %v2747_v37 = vand.u32 4294901760, %v1487_v40 }
  0xd1   :  { %v614_v15 = vpop.f32.mrf.mxu0  ;;  %1549 = vmatpush.msrb.mxu0 %v2747_v37  ;;  %v2752_v63 = vsub.f32 %v1487_v40, %v2747_v37 }
  0xd3   :  { %v699_v16 = vpop.f32.mrf.mxu1  ;;  %v1699_v7 = vand.u32 4294901760, %v2752_v63 }
  0xd4   :  { %v389_v52 = vpop.f32.mrf.mxu2 }
  0xd5   :  { %v390_v62 = vadd.f32 %v389_v52, %v300_v20  ;;  %v1700_v44 = vsub.f32 %v2752_v63, %v1699_v7  ;;  %v163_v52 = vadd.f32 %v2734_v26, %v2660_v25 }
  0xd6   :  { %v491_v18 = vpop.f32.mrf.mxu3 }
  0xd7   :  { %v492_v30 = vadd.f32 %v491_v18, %v390_v62  ;;  %v1701_v59 = vand.u32 4294901760, %v1700_v44 }
  0xd9   :  { %v618_v5 = vpop.f32.mrf.mxu0  ;;  %v615_v31 = vadd.f32 %v614_v15, %v492_v30  ;;  %1702 = vmatpush.msrb.mxu1 %v1701_v59 }
  0xdb   :  { %v703_v33 = vpop.f32.mrf.mxu1  ;;  %v700_v57 = vadd.f32 %v699_v16, %v615_v31 }
  0xdc   :  { %v394_v48 = vpop.f32.mrf.mxu2 }
  0xdd   :  { %v395_v1 = vadd.f32 %v394_v48, %v304_v42  ;;  %v762_v6 = vmax.f32 %v700_v57, 0.0 }
  0xde   :  { %v497_v17 = vpop.f32.mrf.mxu3 }
  0xdf   :  { %v787_v4 = vsel %vm63_vm0, %v762_v6, 0  ;;  %v498_v35 = vadd.f32 %v497_v17, %v395_v1 }
  0xe0   :  { %v2761_v55 = vand.u32 4294901760, %v787_v4 }
  0xe1   :  { %v622_v8 = vpop.f32.mrf.mxu0  ;;  %v619_v3 = vadd.f32 %v618_v5, %v498_v35 }
  0xe2   :  { %v855_v54 = vsub.f32 %v787_v4, %v2761_v55  ;;  %1020 = vmatmul.f32.vlgmr.msra.gmra.mxu3 %v2761_v55 }
  0xe3   :  { %v707_v43 = vpop.f32.mrf.mxu1  ;;  %v704_v11 = vadd.f32 %v703_v33, %v619_v3  ;;  %1904 = vmatpush.msra.mxu3 %v2747_v37  ;;  %v312_v33 = vadd.f32 %v2662_v45, %v163_v52 }
  0xe4   :  { %v399_v29 = vpop.f32.mrf.mxu2  ;;  %v856_v51 = vand.u32 4294901760, %v855_v54  ;;  %1110 = vmatmul.f32.vlgmr.msra.gmra.mxu0 %v855_v54 }
  0xe5   :  { %v400_v9 = vadd.f32 %v399_v29, %v308_v21  ;;  %v763_v15 = vmax.f32 %v704_v11, 0.0 }
  0xe6   :  { %v857_v16 = vsub.f32 %v855_v54, %v856_v51  ;;  %v503_v20 = vpop.f32.mrf.mxu3  ;;  %1212 = vmatmul.f32.vlgmr.msra.gmra.mxu1 %v856_v51 }
  0xe7   :  { %v790_v62 = vsel %vm63_vm0, %v763_v15, 0  ;;  %v504_v18 = vadd.f32 %v503_v20, %v400_v9 }
  0xe8   :  { %v858_v24 = vand.u32 4294901760, %v857_v16  ;;  %v2770_v38 = vand.u32 4294901760, %v790_v62  ;;  %v179_v16 = vadd.f32 %v2734_v26, %v2693_v58 }
  0xe9   :  { %v626_v30 = vpop.f32.mrf.mxu0  ;;  %v623_v5 = vadd.f32 %v622_v8, %v504_v18 }
  0xea   :  { %859 = vmatmul.f32.vlgmr.msra.gmra.mxu2 %v858_v24  ;;  %1024 = vmatmul.f32.gmra.mxu3 %v2770_v38  ;;  %v863_v40 = vsub.f32 %v790_v62, %v2770_v38 }
  0xeb   :  { %v711_v31 = vpop.f32.mrf.mxu1  ;;  %v708_v48 = vadd.f32 %v707_v43, %v623_v5  ;;  %1800 = vmatpush.msra.mxu2 %v2752_v63  ;;  %v316_v43 = vadd.f32 %v2680_v27, %v171_v19  ;;  %v1486_v27 = vld [vmem:[%s3451_s5 + $0x10] sm:$0xff]  ;;  %v187_v19 = vadd.f32 %v2734_v26, %v2709_v61 }
  0xec   :  { %v404_v42 = vpop.f32.mrf.mxu2  ;;  %1115 = vmatmul.f32.gmra.mxu0 %v863_v40  ;;  %v864_v25 = vand.u32 4294901760, %v863_v40  ;;  %v2792_v5 = vand.u32 4294901760, %v1486_v27 }
  0xed   :  { %v405_v57 = vadd.f32 %v404_v42, %v312_v33  ;;  %v764_v1 = vmax.f32 %v708_v48, 0.0  ;;  %v324_v61 = vadd.f32 %v2711_v0, %v187_v19  ;;  %v203_v19 = vadd.f32 %v2734_v26, %v2625_v36 }
  0xee   :  { %v509_v6 = vpop.f32.mrf.mxu3  ;;  %1218 = vmatmul.f32.gmra.mxu1 %v864_v25  ;;  %v865_v17 = vsub.f32 %v863_v40, %v864_v25  ;;  %1551 = vmatpush.msrb.mxu0 %v2792_v5  ;;  %v2799_v48 = vsub.f32 %v1486_v27, %v2792_v5 }
  0xef   :  { %v793_v4 = vsel %vm63_vm0, %v764_v1, 0  ;;  %v510_v35 = vadd.f32 %v509_v6, %v405_v57  ;;  %1906 = vmatpush.msra.mxu3 %v2792_v5 }
  0xf0   :  { %v2779_v44 = vand.u32 4294901760, %v793_v4  ;;  %v866_v45 = vand.u32 4294901760, %v865_v17  ;;  %v1705_v6 = vand.u32 4294901760, %v2799_v48  ;;  %1803 = vmatpush.msra.mxu2 %v2799_v48 }
  0xf1   :  { %v630_v8 = vpop.f32.mrf.mxu0  ;;  %v627_v3 = vadd.f32 %v626_v30, %v510_v35 }
  0xf2   :  { %867 = vmatmul.f32.gmra.mxu2 %v866_v45  ;;  %1028 = vmatmul.f32.gmra.mxu3 %v2779_v44  ;;  %v871_v59 = vsub.f32 %v793_v4, %v2779_v44  ;;  %v1706_v45 = vsub.f32 %v2799_v48, %v1705_v6 }
  0xf3   :  { %v715_v54 = vpop.f32.mrf.mxu1  ;;  %v712_v29 = vadd.f32 %v711_v31, %v627_v3  ;;  %v320_v31 = vadd.f32 %v2696_v39, %v179_v16 }
  0xf4   :  { %v409_v21 = vpop.f32.mrf.mxu2  ;;  %1120 = vmatmul.f32.gmra.mxu0 %v871_v59  ;;  %v872_v46 = vand.u32 4294901760, %v871_v59 }
  0xf5   :  { %v410_v11 = vadd.f32 %v409_v21, %v316_v43  ;;  %v765_v51 = vmax.f32 %v712_v29, 0.0  ;;  %v1707_v43 = vand.u32 4294901760, %v1706_v45 }
  0xf6   :  { %v515_v9 = vpop.f32.mrf.mxu3  ;;  %1224 = vmatmul.f32.gmra.mxu1 %v872_v46  ;;  %v873_v15 = vsub.f32 %v871_v59, %v872_v46 }
  0xf7   :  { %v796_v20 = vsel %vm63_vm0, %v765_v51, 0  ;;  %v516_v52 = vadd.f32 %v515_v9, %v410_v11  ;;  %1708 = vmatpush.msrb.mxu1 %v1707_v43 }
  0xf8   :  { %v2787_v62 = vand.u32 4294901760, %v796_v20  ;;  %v874_v18 = vand.u32 4294901760, %v873_v15 }
  0xf9   :  { %v634_v24 = vpop.f32.mrf.mxu0  ;;  %v631_v30 = vadd.f32 %v630_v8, %v516_v52  ;;  %v195_v52 = vadd.f32 %v2734_v26, %v2722_v49 }
  0xfa   :  { %875 = vmatmul.f32.gmra.mxu2 %v874_v18  ;;  %1032 = vmatmul.f32.gmra.mxu3 %v2787_v62  ;;  %v879_v40 = vsub.f32 %v796_v20, %v2787_v62 }
  0xfb   :  { %v719_v58 = vpop.f32.mrf.mxu1  ;;  %v716_v42 = vadd.f32 %v715_v54, %v631_v30 }
  0xfc   :  { %v414_v33 = vpop.f32.mrf.mxu2  ;;  %1125 = vmatmul.f32.gmra.mxu0 %v879_v40  ;;  %v880_v25 = vand.u32 4294901760, %v879_v40 }
  0xfd   :  { %v415_v57 = vadd.f32 %v414_v33, %v320_v31  ;;  %v766_v1 = vmax.f32 %v716_v42, 0.0  ;;  %v328_v33 = vadd.f32 %v2724_v13, %v195_v52 }
  0xfe   :  { %v521_v17 = vpop.f32.mrf.mxu3  ;;  %1230 = vmatmul.f32.gmra.mxu1 %v880_v25  ;;  %v881_v39 = vsub.f32 %v879_v40, %v880_v25 }
  0xff   :  { %v799_v4 = vsel %vm63_vm0, %v766_v1, 0  ;;  %v522_v35 = vadd.f32 %v521_v17, %v415_v57 }
 0x100   :  { %v2810_v8 = vand.u32 4294901760, %v799_v4  ;;  %v882_v3 = vand.u32 4294901760, %v881_v39 }
 0x101   :  { %v638_v59 = vpop.f32.mrf.mxu0  ;;  %v635_v54 = vadd.f32 %v634_v24, %v522_v35 }
 0x102   :  { %883 = vmatmul.f32.gmra.mxu2 %v882_v3  ;;  %1036 = vmatmul.f32.gmra.mxu3 %v2810_v8  ;;  %v887_v21 = vsub.f32 %v799_v4, %v2810_v8 }
 0x103   :  { %v723_v29 = vpop.f32.mrf.mxu1  ;;  %v720_v11 = vadd.f32 %v719_v58, %v635_v54 }
 0x104   :  { %v419_v46 = vpop.f32.mrf.mxu2  ;;  %1130 = vmatmul.f32.gmra.mxu0 %v887_v21  ;;  %v888_v51 = vand.u32 4294901760, %v887_v21 }
 0x105   :  { %v420_v9 = vadd.f32 %v419_v46, %v324_v61  ;;  %v767_v15 = vmax.f32 %v720_v11, 0.0 }
 0x106   :  { %v527_v16 = vpop.f32.mrf.mxu3  ;;  %1236 = vmatmul.f32.gmra.mxu1 %v888_v51  ;;  %v889_v20 = vsub.f32 %v887_v21, %v888_v51  ;;  %v332_v21 = vadd.f32 %v2631_v56, %v203_v19  ;;  %v1485_v56 = vld [vmem:[%s3451_s5 + $0x8] sm:$0xff] }
 0x107   :  { %v802_v18 = vsel %vm63_vm0, %v767_v15, 0  ;;  %v528_v24 = vadd.f32 %v527_v16, %v420_v9  ;;  %v211_v15 = vadd.f32 %v2734_v26, %v2638_v23 }
 0x108   :  { %v2818_v27 = vand.u32 4294901760, %v802_v18  ;;  %v890_v30 = vand.u32 4294901760, %v889_v20 }
 0x109   :  { %v642_v0 = vpop.f32.mrf.mxu0  ;;  %v639_v40 = vadd.f32 %v638_v59, %v528_v24 }
 0x10a   :  { %891 = vmatmul.f32.gmra.mxu2 %v890_v30  ;;  %1040 = vmatmul.f32.gmra.mxu3 %v2818_v27  ;;  %v895_v58 = vsub.f32 %v802_v18, %v2818_v27 }
 0x10b   :  { %v727_v31 = vpop.f32.mrf.mxu1  ;;  %v724_v25 = vadd.f32 %v723_v29, %v639_v40 }
 0x10c   :  { %v424_v42 = vpop.f32.mrf.mxu2  ;;  %1135 = vmatmul.f32.gmra.mxu0 %v895_v58  ;;  %v896_v49 = vand.u32 4294901760, %v895_v58 }
 0x10d   :  { %v425_v57 = vadd.f32 %v424_v42, %v328_v33  ;;  %v768_v1 = vmax.f32 %v724_v25, 0.0 }
 0x10e   :  { %v533_v17 = vpop.f32.mrf.mxu3  ;;  %1242 = vmatmul.f32.gmra.mxu1 %v896_v49  ;;  %v897_v39 = vsub.f32 %v895_v58, %v896_v49  ;;  %v336_v58 = vadd.f32 %v2644_v22, %v211_v15 }
 0x10f   :  { %v805_v4 = vsel %vm63_vm0, %v768_v1, 0  ;;  %v534_v35 = vadd.f32 %v533_v17, %v425_v57 }
 0x110   :  { %v2826_v45 = vand.u32 4294901760, %v805_v4  ;;  %v898_v3 = vand.u32 4294901760, %v897_v39  ;;  %v219_v39 = vadd.f32 %v2734_v26, %v2651_v34 }
 0x111   :  { %v646_v59 = vpop.f32.mrf.mxu0  ;;  %v643_v13 = vadd.f32 %v642_v0, %v534_v35  ;;  %v2839_v0 = vand.u32 4294901760, %v1485_v56 }
 0x112   :  { %899 = vmatmul.f32.gmra.mxu2 %v898_v3  ;;  %1044 = vmatmul.f32.gmra.mxu3 %v2826_v45  ;;  %v903_v54 = vsub.f32 %v805_v4, %v2826_v45  ;;  %v340_v34 = vadd.f32 %v2657_v32, %v219_v39 }
 0x113   :  { %v731_v43 = vpop.f32.mrf.mxu1  ;;  %v728_v61 = vadd.f32 %v727_v31, %v643_v13  ;;  %1553 = vmatpush.msrb.mxu0 %v2839_v0  ;;  %v2846_v42 = vsub.f32 %v1485_v56, %v2839_v0  ;;  %1908 = vmatpush.msra.mxu3 %v2839_v0 }
 0x114   :  { %v429_v29 = vpop.f32.mrf.mxu2  ;;  %1140 = vmatmul.f32.gmra.mxu0 %v903_v54  ;;  %v904_v36 = vand.u32 4294901760, %v903_v54 }
 0x115   :  { %v430_v46 = vadd.f32 %v429_v29, %v332_v21  ;;  %v769_v11 = vmax.f32 %v728_v61, 0.0  ;;  %v1711_v1 = vand.u32 4294901760, %v2846_v42  ;;  %1806 = vmatpush.msra.mxu2 %v2846_v42 }
 0x116   :  { %v539_v51 = vpop.f32.mrf.mxu3  ;;  %1248 = vmatmul.f32.gmra.mxu1 %v904_v36  ;;  %v905_v9 = vsub.f32 %v903_v54, %v904_v36 }
 0x117   :  { %v808_v16 = vsel %vm63_vm0, %v769_v11, 0  ;;  %v540_v20 = vadd.f32 %v539_v51, %v430_v46  ;;  %v1712_v35 = vsub.f32 %v2846_v42, %v1711_v1 }
 0x118   :  { %v2834_v52 = vand.u32 4294901760, %v808_v16  ;;  %v906_v18 = vand.u32 4294901760, %v905_v9 }
 0x119   :  { %v650_v24 = vpop.f32.mrf.mxu0  ;;  %v647_v30 = vadd.f32 %v646_v59, %v540_v20 }
 0x11a   :  { %907 = vmatmul.f32.gmra.mxu2 %v906_v18  ;;  %1048 = vmatmul.f32.gmra.mxu3 %v2834_v52  ;;  %v911_v40 = vsub.f32 %v808_v16, %v2834_v52  ;;  %v227_v16 = vadd.f32 %v2734_v26, %v2664_v41 }
 0x11b   :  { %v735_v23 = vpop.f32.mrf.mxu1  ;;  %v732_v33 = vadd.f32 %v731_v43, %v647_v30  ;;  %v1713_v43 = vand.u32 4294901760, %v1712_v35 }
 0x11c   :  { %v434_v31 = vpop.f32.mrf.mxu2  ;;  %1145 = vmatmul.f32.gmra.mxu0 %v911_v40  ;;  %v912_v25 = vand.u32 4294901760, %v911_v40 }
 0x11d   :  { %v435_v49 = vadd.f32 %v434_v31, %v336_v58  ;;  %v770_v57 = vmax.f32 %v732_v33, 0.0  ;;  %1714 = vmatpush.msrb.mxu1 %v1713_v43  ;;  %v344_v58 = vadd.f32 %v2673_v10, %v227_v16 }
 0x11e   :  { %v545_v17 = vpop.f32.mrf.mxu3  ;;  %1254 = vmatmul.f32.gmra.mxu1 %v912_v25  ;;  %v913_v22 = vsub.f32 %v911_v40, %v912_v25 }
 0x11f   :  { %v811_v19 = vsel %vm63_vm0, %v770_v57, 0  ;;  %v546_v4 = vadd.f32 %v545_v17, %v435_v49 }
 0x120   :  { %v2857_v3 = vand.u32 4294901760, %v811_v19  ;;  %v914_v59 = vand.u32 4294901760, %v913_v22  ;;  %v235_v22 = vadd.f32 %v2734_v26, %v2682_v50 }
 0x121   :  { %v654_v13 = vpop.f32.mrf.mxu0  ;;  %v651_v54 = vadd.f32 %v650_v24, %v546_v4 }
 0x122   :  { %915 = vmatmul.f32.gmra.mxu2 %v914_v59  ;;  %1052 = vmatmul.f32.gmra.mxu3 %v2857_v3  ;;  %v919_v21 = vsub.f32 %v811_v19, %v2857_v3  ;;  %v348_v43 = vadd.f32 %v2690_v53, %v235_v22  ;;  %v1484_v53 = vld [vmem:[%s3451_s5] sm:$0xff] }
 0x123   :  { %v739_v29 = vpop.f32.mrf.mxu1  ;;  %v736_v36 = vadd.f32 %v735_v23, %v651_v54 }
 0x124   :  { %v439_v61 = vpop.f32.mrf.mxu2  ;;  %1150 = vmatmul.f32.gmra.mxu0 %v919_v21  ;;  %v920_v46 = vand.u32 4294901760, %v919_v21 }
 0x125   :  { %v440_v11 = vadd.f32 %v439_v61, %v340_v34  ;;  %v771_v51 = vmax.f32 %v736_v36, 0.0 }
 0x126   :  { %v551_v9 = vpop.f32.mrf.mxu3  ;;  %1260 = vmatmul.f32.gmra.mxu1 %v920_v46  ;;  %v921_v15 = vsub.f32 %v919_v21, %v920_v46 }
 0x127   :  { %v814_v20 = vsel %vm63_vm0, %v771_v51, 0  ;;  %v552_v18 = vadd.f32 %v551_v9, %v440_v11  ;;  %v243_v11 = vadd.f32 %v2734_v26, %v2699_v47 }
 0x128   :  { %v2865_v24 = vand.u32 4294901760, %v814_v20  ;;  %v922_v56 = vand.u32 4294901760, %v921_v15 }
 0x129   :  { %v658_v32 = vpop.f32.mrf.mxu0  ;;  %v655_v30 = vadd.f32 %v654_v13, %v552_v18  ;;  %v2886_v18 = vand.u32 4294901760, %v1484_v53  ;;  %v352_v47 = vadd.f32 %v2706_v28, %v243_v11 }
 0x12a   :  { %923 = vmatmul.f32.gmra.mxu2 %v922_v56  ;;  %1056 = vmatmul.f32.gmra.mxu3 %v2865_v24  ;;  %v927_v40 = vsub.f32 %v814_v20, %v2865_v24 }
 0x12b   :  { %v743_v23 = vpop.f32.mrf.mxu1  ;;  %v740_v33 = vadd.f32 %v739_v29, %v655_v30  ;;  %1555 = vmatpush.msrb.mxu0 %v2886_v18  ;;  %1910 = vmatpush.msra.mxu3 %v2886_v18 }
 0x12c   :  { %v444_v31 = vpop.f32.mrf.mxu2  ;;  %1155 = vmatmul.f32.gmra.mxu0 %v927_v40  ;;  %v928_v41 = vand.u32 4294901760, %v927_v40 }
 0x12d   :  { %v445_v25 = vadd.f32 %v444_v31, %v344_v58  ;;  %v772_v49 = vmax.f32 %v740_v33, 0.0  ;;  %2023 = vmatpush.msra.mxu0 %v1699_v7 }
 0x12e   :  { %v557_v57 = vpop.f32.mrf.mxu3  ;;  %1266 = vmatmul.f32.gmra.mxu1 %v928_v41  ;;  %v929_v17 = vsub.f32 %v927_v40, %v928_v41 }
 0x12f   :  { %v817_v39 = vsel %vm63_vm0, %v772_v49, 0  ;;  %v558_v19 = vadd.f32 %v557_v57, %v445_v25  ;;  %v251_v57 = vadd.f32 %v2734_v26, %v2713_v2  ;;  %2027 = vmatpush.msra.mxu0 %v1705_v6 }
 0x130   :  { %v2873_v4 = vand.u32 4294901760, %v817_v39  ;;  %v930_v35 = vand.u32 4294901760, %v929_v17 }
 0x131   :  { %v662_v59 = vpop.f32.mrf.mxu0  ;;  %v659_v10 = vadd.f32 %v658_v32, %v558_v19  ;;  %2031 = vmatpush.msra.mxu0 %v1711_v1  ;;  %v356_v7 = vadd.f32 %v2719_v60, %v251_v57 }
 0x132   :  { %931 = vmatmul.f32.gmra.mxu2 %v930_v35  ;;  %1060 = vmatmul.f32.gmra.mxu3 %v2873_v4  ;;  %v935_v13 = vsub.f32 %v817_v39, %v2873_v4 }
 0x133   :  { %v747_v54 = vpop.f32.mrf.mxu1  ;;  %v744_v29 = vadd.f32 %v743_v23, %v659_v10  ;;  %v1716_v23 = vsub.f32 %v1484_v53, %v2886_v18 }
 0x134   :  { %v449_v21 = vpop.f32.mrf.mxu2  ;;  %1160 = vmatmul.f32.gmra.mxu0 %v935_v13  ;;  %v936_v50 = vand.u32 4294901760, %v935_v13 }
 0x135   :  { %v450_v34 = vadd.f32 %v449_v21, %v348_v43  ;;  %v773_v61 = vmax.f32 %v744_v29, 0.0  ;;  %v1717_v25 = vand.u32 4294901760, %v1716_v23  ;;  %1809 = vmatpush.msra.mxu2 %v1716_v23  ;;  %v259_v29 = vadd.f32 %v2734_v26, %v2726_v12 }
 0x136   :  { %v563_v36 = vpop.f32.mrf.mxu3  ;;  %1272 = vmatmul.f32.gmra.mxu1 %v936_v50  ;;  %v937_v46 = vsub.f32 %v935_v13, %v936_v50 }
 0x137   :  { %v820_v51 = vsel %vm63_vm0, %v773_v61, 0  ;;  %v564_v9 = vadd.f32 %v563_v36, %v450_v34  ;;  %v1718_v39 = vsub.f32 %v1716_v23, %v1717_v25  ;;  %2035 = vmatpush.msra.mxu0 %v1717_v25  ;;  %v2218_v25 = vld [vmem:[%s3448_s0 + $0x8] sm:$0xff] }
 0x138   :  { %v2881_v15 = vand.u32 4294901760, %v820_v51  ;;  %v938_v16 = vand.u32 4294901760, %v937_v46  ;;  %v360_v46 = vadd.f32 %v2737_v14, %v259_v29 }
 0x139   :  { %v663_v20 = vadd.f32 %v662_v59, %v564_v9  ;;  %v666_v32 = vpop.f32.mrf.mxu0  ;;  %v1719_v63 = vand.u32 4294901760, %v1718_v39 }
 0x13a   :  { %939 = vmatmul.f32.gmra.mxu2 %v938_v16  ;;  %1064 = vmatmul.f32.gmra.mxu3 %v2881_v15  ;;  %v943_v56 = vsub.f32 %v820_v51, %v2881_v15 }
 0x13b   :  { %v748_v40 = vadd.f32 %v747_v54, %v663_v20  ;;  %v751_v31 = vpop.f32.mrf.mxu1  ;;  %1720 = vmatpush.msrb.mxu1 %v1719_v63 }
 0x13c   :  { %v454_v30 = vpop.f32.mrf.mxu2  ;;  %1165 = vmatmul.f32.gmra.mxu0 %v943_v56  ;;  %v944_v58 = vand.u32 4294901760, %v943_v56 }
 0x13d   :  { %v455_v33 = vadd.f32 %v454_v30, %v352_v47  ;;  %v774_v41 = vmax.f32 %v748_v40, 0.0  ;;  %2114 = vmatpush.msra.mxu1 %v2747_v37 }
 0x13e   :  { %v569_v49 = vpop.f32.mrf.mxu3  ;;  %1278 = vmatmul.f32.gmra.mxu1 %v944_v58  ;;  %v945_v28 = vsub.f32 %v943_v56, %v944_v58 }
 0x13f   :  { %v823_v17 = vsel %vm63_vm0, %v774_v41, 0  ;;  %v570_v22 = vadd.f32 %v569_v49, %v455_v33  ;;  %2116 = vmatpush.msra.mxu1 %v2792_v5  ;;  %v2217_v5 = vld [vmem:[%s3448_s0] sm:$0xff]  ;;  %v1492_v49 = vsel %vm63_vm0, %v2218_v25, 0 }
 0x140   :  { %v2901_v19 = vand.u32 4294901760, %v823_v17  ;;  %v946_v35 = vand.u32 4294901760, %v945_v28  ;;  %v1489_v51 = vsel %vm63_vm0, %v2217_v5, 0 }
 0x141   :  { %v667_v59 = vadd.f32 %v666_v32, %v570_v22  ;;  %v670_v6 = vpop.f32.mrf.mxu0  ;;  %2118 = vmatpush.msra.mxu1 %v2839_v0  ;;  %v2925_v32 = vand.u32 4294901760, %v1489_v51 }
 0x142   :  { %947 = vmatmul.f32.gmra.mxu2 %v946_v35  ;;  %1068 = vmatmul.f32.gmra.mxu3 %v2901_v19  ;;  %v951_v2 = vsub.f32 %v823_v17, %v2901_v19  ;;  %v2942_v35 = vand.u32 4294901760, %v1492_v49 }
 0x143   :  { %v752_v13 = vadd.f32 %v751_v31, %v667_v59  ;;  %v755_v1 = vpop.f32.mrf.mxu1  ;;  %2120 = vmatpush.msra.mxu1 %v2886_v18  ;;  %v2932_v31 = vsub.f32 %v1489_v51, %v2925_v32 }
 0x144   :  { %v459_v10 = vpop.f32.mrf.mxu2  ;;  %1170 = vmatmul.f32.gmra.mxu0 %v951_v2  ;;  %v952_v48 = vand.u32 4294901760, %v951_v2 }
 0x145   :  { %v460_v54 = vadd.f32 %v459_v10, %v356_v7  ;;  %v775_v43 = vmax.f32 %v752_v13, 0.0  ;;  %v3467_v39 = vand.u32 4294901760, %v2932_v31  ;;  %v2950_v7 = vsub.f32 %v1492_v49, %v2942_v35  ;;  %v2219_v10 = vld [vmem:[%s3448_s0 + $0x10] sm:$0xff] }
 0x146   :  { %v575_v42 = vpop.f32.mrf.mxu3  ;;  %1284 = vmatmul.f32.gmra.mxu1 %v952_v48  ;;  %v953_v21 = vsub.f32 %v951_v2, %v952_v48  ;;  %v1495_v13 = vsel %vm63_vm0, %v2219_v10, 0 }
 0x147   :  { %v826_v60 = vsel %vm63_vm0, %v775_v43, 0  ;;  %v576_v50 = vadd.f32 %v575_v42, %v460_v54  ;;  %v1559_v2 = vsub.f32 %v2932_v31, %v3467_v39  ;;  %v3465_v43 = vand.u32 4294901760, %v2950_v7 }
 0x148   :  { %v2913_v34 = vand.u32 4294901760, %v826_v60  ;;  %v954_v61 = vand.u32 4294901760, %v953_v21  ;;  %v2957_v42 = vand.u32 4294901760, %v1495_v13 }
 0x149   :  { %v671_v36 = vadd.f32 %v670_v6, %v576_v50  ;;  %v674_v53 = vpop.f32.mrf.mxu0  ;;  %v1560_v54 = vand.u32 4294901760, %v1559_v2  ;;  %v1567_v29 = vsub.f32 %v2950_v7, %v3465_v43 }
 0x14a   :  { %955 = vmatmul.f32.gmra.mxu2 %v954_v61  ;;  %1072 = vmatmul.f32.gmra.mxu3 %v2913_v34  ;;  %v959_v37 = vsub.f32 %v826_v60, %v2913_v34  ;;  %v2964_v60 = vsub.f32 %v1495_v13, %v2957_v42  ;;  %v2220_v61 = vld [vmem:[%s3448_s0 + $0x18] sm:$0xff] }
 0x14b   :  { %v756_v12 = vadd.f32 %v755_v1, %v671_v36  ;;  %v759_v47 = vpop.f32.mrf.mxu1  ;;  %v1498_v36 = vsel %vm63_vm0, %v2220_v61, 0 }
 0x14c   :  { %v464_v11 = vpop.f32.mrf.mxu2  ;;  %1175 = vmatmul.f32.gmra.mxu0 %v959_v37  ;;  %v960_v26 = vand.u32 4294901760, %v959_v37 }
 0x14d   :  { %v465_v0 = vadd.f32 %v464_v11, %v360_v46  ;;  %v776_v9 = vmax.f32 %v756_v12, 0.0  ;;  %v3464_v46 = vand.u32 4294901760, %v2964_v60  ;;  %v2972_v11 = vand.u32 4294901760, %v1498_v36 }
 0x14e   :  { %v581_v16 = vpop.f32.mrf.mxu3  ;;  %1290 = vmatmul.f32.gmra.mxu1 %v960_v26  ;;  %v961_v20 = vsub.f32 %v959_v37, %v960_v26  ;;  %v1568_v37 = vand.u32 4294901760, %v1567_v29  ;;  %v2979_v26 = vld [vmem:[%s3452_s4] ss:$0 sm:$0xff] }
 0x14f   :  { %v829_v14 = vsel %vm63_vm0, %v776_v9, 0  ;;  %v582_v56 = vadd.f32 %v581_v16, %v465_v0  ;;  %v1575_v51 = vsub.f32 %v2964_v60, %v3464_v46  ;;  %v2985_v0 = vsub.f32 %v1498_v36, %v2972_v11 }
 0x150   :  { %v2927_v18 = vand.u32 4294901760, %v829_v14  ;;  %v962_v30 = vand.u32 4294901760, %v961_v20 }
 0x151   :  { %v675_v40 = vadd.f32 %v674_v53, %v582_v56  ;;  %v1576_v56 = vand.u32 4294901760, %v1575_v51 }
 0x152   :  { %963 = vmatmul.f32.gmra.mxu2 %v962_v30  ;;  %1076 = vmatmul.f32.gmra.mxu3 %v2927_v18  ;;  %v967_v23 = vsub.f32 %v829_v14, %v2927_v18 }
 0x153   :  { %v760_v58 = vadd.f32 %v759_v47, %v675_v40  ;;  %v3462_v47 = vand.u32 4294901760, %v2985_v0 }
 0x154   :  { %1180 = vmatmul.f32.gmra.mxu0 %v967_v23  ;;  %v968_v33 = vand.u32 4294901760, %v967_v23 }
 0x155   :  { %v777_v41 = vmax.f32 %v760_v58, 0.0 }
 0x156   :  { %1296 = vmatmul.f32.gmra.mxu1 %v968_v33  ;;  %v969_v28 = vsub.f32 %v967_v23, %v968_v33  ;;  %v1583_v33 = vsub.f32 %v2985_v0, %v3462_v47 }
 0x157   :  { %v832_v57 = vsel %vm63_vm0, %v777_v41, 0 }
 0x158   :  { %v2939_v17 = vand.u32 4294901760, %v832_v57  ;;  %v970_v22 = vand.u32 4294901760, %v969_v28 }
 0x15a   :  { %971 = vmatmul.f32.gmra.mxu2 %v970_v22  ;;  %1080 = vmatmul.f32.gmra.mxu3 %v2939_v17  ;;  %v975_v59 = vsub.f32 %v832_v57, %v2939_v17 }
 0x15c   :  { %1185 = vmatmul.f32.gmra.mxu0 %v975_v59  ;;  %v976_v63 = vand.u32 4294901760, %v975_v59 }
 0x15e   :  { %1302 = vmatmul.f32.gmra.mxu1 %v976_v63  ;;  %v977_v48 = vsub.f32 %v975_v59, %v976_v63  ;;  %v1584_v63 = vand.u32 4294901760, %v1583_v33 }
 0x160   :  { %v978_v6 = vand.u32 4294901760, %v977_v48 }
 0x161   :  { %v1111_v1 = vpop.f32.mrf.mxu0 }
 0x162   :  { %979 = vmatmul.f32.gmra.mxu2 %v978_v6  ;;  %1420 = vmatmul.f32.vlgmr.msrb.gmra.mxu3 %v2761_v55 }
 0x163   :  { %v1213_v21 = vpop.f32.mrf.mxu1 }
 0x164   :  { %1561 = vmatmul.f32.vlgmr.msrb.gmra.mxu0 %v1560_v54 }
 0x165   :  { %v1021_v50 = vpop.f32.mrf.mxu3 }
 0x166   :  { %1722 = vmatmul.f32.vlgmr.msrb.gmra.mxu1 %v2925_v32 }
 0x169   :  { %v1116_v12 = vpop.f32.mrf.mxu0 }
 0x16a   :  { %1335 = vmatmul.f32.vlgmr.msrb.gmra.mxu2 %v2761_v55  ;;  %1424 = vmatmul.f32.gmra.mxu3 %v2770_v38  ;;  %v2221_v55 = vld [vmem:[%s3448_s0 + $0x20] sm:$0xff] }
 0x16b   :  { %v1219_v5 = vpop.f32.mrf.mxu1  ;;  %v1501_v53 = vsel %vm63_vm0, %v2221_v55, 0 }
 0x16c   :  { %1569 = vmatmul.f32.gmra.mxu0 %v1568_v37  ;;  %v2994_v30 = vand.u32 4294901760, %v1501_v53 }
 0x16d   :  { %v860_v9 = vpop.f32.mrf.mxu2  ;;  %v1025_v16 = vpop.f32.mrf.mxu3 }
 0x16e   :  { %v861_v20 = vadd.f32 %v2979_v26, %v860_v9  ;;  %1726 = vmatmul.f32.gmra.mxu1 %v2942_v35  ;;  %v3002_v41 = vsub.f32 %v1501_v53, %v2994_v30 }
 0x170   :  { %v1022_v14 = vadd.f32 %v1021_v50, %v861_v20  ;;  %v3461_v2 = vand.u32 4294901760, %v3002_v41 }
 0x171   :  { %v1121_v40 = vpop.f32.mrf.mxu0 }
 0x172   :  { %1339 = vmatmul.f32.gmra.mxu2 %v2770_v38  ;;  %1428 = vmatmul.f32.gmra.mxu3 %v2779_v44  ;;  %v1112_v23 = vadd.f32 %v1111_v1, %v1022_v14  ;;  %v2222_v38 = vld [vmem:[%s3448_s0 + $0x28] sm:$0xff]  ;;  %v1591_v54 = vsub.f32 %v3002_v41, %v3461_v2 }
 0x173   :  { %v1225_v58 = vpop.f32.mrf.mxu1  ;;  %v1504_v57 = vsel %vm63_vm0, %v2222_v38, 0 }
 0x174   :  { %1577 = vmatmul.f32.gmra.mxu0 %v1576_v56  ;;  %v3004_v25 = vadd.f32 %v1213_v21, %v1112_v23  ;;  %v3013_v10 = vand.u32 4294901760, %v1504_v57 }
 0x175   :  { %v868_v49 = vpop.f32.mrf.mxu2  ;;  %v1029_v28 = vpop.f32.mrf.mxu3 }
 0x176   :  { %v869_v22 = vadd.f32 %v2979_v26, %v868_v49  ;;  %1730 = vmatmul.f32.gmra.mxu1 %v2957_v42  ;;  %v3021_v1 = vsub.f32 %v1504_v57, %v3013_v10 }
 0x178   :  { %v1026_v59 = vadd.f32 %v1025_v16, %v869_v22  ;;  %v3459_v51 = vand.u32 4294901760, %v3021_v1 }
 0x179   :  { %v1126_v13 = vpop.f32.mrf.mxu0 }
 0x17a   :  { %1343 = vmatmul.f32.gmra.mxu2 %v2779_v44  ;;  %1432 = vmatmul.f32.gmra.mxu3 %v2787_v62  ;;  %v1117_v48 = vadd.f32 %v1116_v12, %v1026_v59  ;;  %v2223_v44 = vld [vmem:[%s3448_s0 + $0x30] sm:$0xff]  ;;  %v1592_v12 = vand.u32 4294901760, %v1591_v54  ;;  %v1599_v53 = vsub.f32 %v3021_v1, %v3459_v51 }
 0x17b   :  { %v1231_v6 = vpop.f32.mrf.mxu1  ;;  %v1507_v61 = vsel %vm63_vm0, %v2223_v44, 0 }
 0x17c   :  { %1585 = vmatmul.f32.gmra.mxu0 %v1584_v63  ;;  %v3023_v21 = vadd.f32 %v1219_v5, %v1117_v48  ;;  %v3032_v9 = vand.u32 4294901760, %v1507_v61 }
 0x17d   :  { %v876_v29 = vpop.f32.mrf.mxu2  ;;  %v1033_v50 = vpop.f32.mrf.mxu3 }
 0x17e   :  { %v877_v36 = vadd.f32 %v2979_v26, %v876_v29  ;;  %1734 = vmatmul.f32.gmra.mxu1 %v2972_v11  ;;  %v3040_v20 = vsub.f32 %v1507_v61, %v3032_v9 }
 0x180   :  { %v1030_v37 = vadd.f32 %v1029_v28, %v877_v36  ;;  %v1600_v28 = vand.u32 4294901760, %v1599_v53  ;;  %v3458_v38 = vand.u32 4294901760, %v3040_v20 }
 0x181   :  { %v1131_v5 = vpop.f32.mrf.mxu0 }
 0x182   :  { %1347 = vmatmul.f32.gmra.mxu2 %v2787_v62  ;;  %1436 = vmatmul.f32.gmra.mxu3 %v2810_v8  ;;  %v1122_v16 = vadd.f32 %v1121_v40, %v1030_v37  ;;  %v2224_v62 = vld [vmem:[%s3448_s0 + $0x38] sm:$0xff]  ;;  %v1607_v63 = vsub.f32 %v3040_v20, %v3458_v38 }
 0x183   :  { %v1237_v55 = vpop.f32.mrf.mxu1  ;;  %v1510_v33 = vsel %vm63_vm0, %v2224_v62, 0 }
 0x184   :  { %1593 = vmatmul.f32.gmra.mxu0 %v1592_v12  ;;  %v3042_v14 = vadd.f32 %v1225_v58, %v1122_v16  ;;  %v3051_v57 = vand.u32 4294901760, %v1510_v33  ;;  %v1608_v36 = vand.u32 4294901760, %v1607_v63 }
 0x185   :  { %v884_v56 = vpop.f32.mrf.mxu2  ;;  %v1037_v23 = vpop.f32.mrf.mxu3 }
 0x186   :  { %v885_v40 = vadd.f32 %v2979_v26, %v884_v56  ;;  %1738 = vmatmul.f32.gmra.mxu1 %v2994_v30  ;;  %v3059_v48 = vsub.f32 %v1510_v33, %v3051_v57 }
 0x188   :  { %v1034_v49 = vadd.f32 %v1033_v50, %v885_v40  ;;  %v3456_v37 = vand.u32 4294901760, %v3059_v48 }
 0x189   :  { %v1136_v58 = vpop.f32.mrf.mxu0 }
 0x18a   :  { %1351 = vmatmul.f32.gmra.mxu2 %v2810_v8  ;;  %1440 = vmatmul.f32.gmra.mxu3 %v2818_v27  ;;  %v1127_v22 = vadd.f32 %v1126_v13, %v1034_v49  ;;  %v2225_v8 = vld [vmem:[%s3448_s0 + $0x40] sm:$0xff]  ;;  %v1615_v56 = vsub.f32 %v3059_v48, %v3456_v37 }
 0x18b   :  { %v1243_v59 = vpop.f32.mrf.mxu1  ;;  %v1513_v44 = vsel %vm63_vm0, %v2225_v8, 0 }
 0x18c   :  { %1601 = vmatmul.f32.gmra.mxu0 %v1600_v28  ;;  %v3061_v54 = vadd.f32 %v1231_v6, %v1127_v22  ;;  %v3070_v12 = vand.u32 4294901760, %v1513_v44  ;;  %v1616_v22 = vand.u32 4294901760, %v1615_v56 }
 0x18d   :  { %v892_v29 = vpop.f32.mrf.mxu2  ;;  %v1041_v50 = vpop.f32.mrf.mxu3 }
 0x18e   :  { %v893_v13 = vadd.f32 %v2979_v26, %v892_v29  ;;  %1742 = vmatmul.f32.gmra.mxu1 %v3013_v10  ;;  %v3078_v62 = vsub.f32 %v1513_v44, %v3070_v12 }
 0x190   :  { %v1038_v61 = vadd.f32 %v1037_v23, %v893_v13  ;;  %v3455_v63 = vand.u32 4294901760, %v3078_v62 }
 0x191   :  { %v1141_v6 = vpop.f32.mrf.mxu0 }
 0x192   :  { %1355 = vmatmul.f32.gmra.mxu2 %v2818_v27  ;;  %1444 = vmatmul.f32.gmra.mxu3 %v2826_v45  ;;  %v1132_v16 = vadd.f32 %v1131_v5, %v1038_v61  ;;  %v2226_v27 = vld [vmem:[%s3448_s0 + $0x48] sm:$0xff]  ;;  %v1623_v13 = vsub.f32 %v3078_v62, %v3455_v63 }
 0x193   :  { %v1249_v53 = vpop.f32.mrf.mxu1  ;;  %v1516_v49 = vsel %vm63_vm0, %v2226_v27, 0 }
 0x194   :  { %1609 = vmatmul.f32.gmra.mxu0 %v1608_v36  ;;  %v3080_v23 = vadd.f32 %v1237_v55, %v1132_v16  ;;  %v3089_v29 = vand.u32 4294901760, %v1516_v49  ;;  %v1624_v27 = vand.u32 4294901760, %v1623_v13 }
 0x195   :  { %v900_v33 = vpop.f32.mrf.mxu2  ;;  %v1045_v40 = vpop.f32.mrf.mxu3 }
 0x196   :  { %v901_v5 = vadd.f32 %v2979_v26, %v900_v33  ;;  %1746 = vmatmul.f32.gmra.mxu1 %v3032_v9  ;;  %v3097_v61 = vsub.f32 %v1516_v49, %v3089_v29 }
 0x198   :  { %v1042_v28 = vadd.f32 %v1041_v50, %v901_v5  ;;  %v3454_v5 = vand.u32 4294901760, %v3097_v61 }
 0x199   :  { %v1146_v55 = vpop.f32.mrf.mxu0 }
 0x19a   :  { %1359 = vmatmul.f32.gmra.mxu2 %v2826_v45  ;;  %1448 = vmatmul.f32.gmra.mxu3 %v2834_v52  ;;  %v1137_v8 = vadd.f32 %v1136_v58, %v1042_v28  ;;  %v2227_v45 = vld [vmem:[%s3448_s0 + $0x50] sm:$0xff] }
 0x19b   :  { %v1255_v44 = vpop.f32.mrf.mxu1  ;;  %v1519_v56 = vsel %vm63_vm0, %v2227_v45, 0 }
 0x19c   :  { %1617 = vmatmul.f32.gmra.mxu0 %v1616_v22  ;;  %v3099_v50 = vadd.f32 %v1243_v59, %v1137_v8  ;;  %v3108_v49 = vand.u32 4294901760, %v1519_v56  ;;  %v1631_v8 = vsub.f32 %v3097_v61, %v3454_v5 }
 0x19d   :  { %v908_v36 = vpop.f32.mrf.mxu2  ;;  %v1049_v16 = vpop.f32.mrf.mxu3 }
 0x19e   :  { %v909_v58 = vadd.f32 %v2979_v26, %v908_v36  ;;  %1750 = vmatmul.f32.gmra.mxu1 %v3051_v57  ;;  %v3116_v36 = vsub.f32 %v1519_v56, %v3108_v49 }
 0x1a0   :  { %v1046_v33 = vadd.f32 %v1045_v40, %v909_v58  ;;  %v3457_v5 = vand.u32 4294901760, %v3116_v36 }
 0x1a1   :  { %v1151_v59 = vpop.f32.mrf.mxu0 }
 0x1a2   :  { %1363 = vmatmul.f32.gmra.mxu2 %v2834_v52  ;;  %1452 = vmatmul.f32.gmra.mxu3 %v2857_v3  ;;  %v1142_v28 = vadd.f32 %v1141_v6, %v1046_v33  ;;  %v2228_v52 = vld [vmem:[%s3448_s0 + $0x58] sm:$0xff] }
 0x1a3   :  { %v1261_v22 = vpop.f32.mrf.mxu1  ;;  %v1522_v58 = vsel %vm63_vm0, %v2228_v52, 0 }
 0x1a4   :  { %1625 = vmatmul.f32.gmra.mxu0 %v1624_v27  ;;  %v3118_v40 = vadd.f32 %v1249_v53, %v1142_v28  ;;  %v1632_v27 = vand.u32 4294901760, %v1631_v8  ;;  %v3127_v56 = vand.u32 4294901760, %v1522_v58 }
 0x1a5   :  { %v916_v13 = vpop.f32.mrf.mxu2  ;;  %v1053_v45 = vpop.f32.mrf.mxu3 }
 0x1a6   :  { %v917_v6 = vadd.f32 %v2979_v26, %v916_v13  ;;  %1754 = vmatmul.f32.gmra.mxu1 %v3070_v12  ;;  %v1639_v13 = vsub.f32 %v3116_v36, %v3457_v5  ;;  %v3135_v52 = vsub.f32 %v1522_v58, %v3127_v56 }
 0x1a8   :  { %v1050_v33 = vadd.f32 %v1049_v16, %v917_v6  ;;  %v3460_v5 = vand.u32 4294901760, %v3135_v52 }
 0x1a9   :  { %v1156_v53 = vpop.f32.mrf.mxu0 }
 0x1aa   :  { %1367 = vmatmul.f32.gmra.mxu2 %v2857_v3  ;;  %1456 = vmatmul.f32.gmra.mxu3 %v2865_v24  ;;  %v1147_v28 = vadd.f32 %v1146_v55, %v1050_v33  ;;  %v2229_v3 = vld [vmem:[%s3448_s0 + $0x60] sm:$0xff] }
 0x1ab   :  { %v1267_v63 = vpop.f32.mrf.mxu1  ;;  %v1525_v37 = vsel %vm63_vm0, %v2229_v3, 0 }
 0x1ac   :  { %1633 = vmatmul.f32.gmra.mxu0 %v1632_v27  ;;  %v3137_v16 = vadd.f32 %v1255_v44, %v1147_v28  ;;  %v1640_v27 = vand.u32 4294901760, %v1639_v13  ;;  %v3146_v58 = vand.u32 4294901760, %v1525_v37 }
 0x1ad   :  { %v924_v8 = vpop.f32.mrf.mxu2  ;;  %v1057_v6 = vpop.f32.mrf.mxu3 }
 0x1ae   :  { %v925_v55 = vadd.f32 %v2979_v26, %v924_v8  ;;  %1758 = vmatmul.f32.gmra.mxu1 %v3089_v29  ;;  %3476 = vst [vmem:[#allocation2_spill] sm:$0xff] %v3146_v58  ;;  %v1647_v8 = vsub.f32 %v3135_v52, %v3460_v5  ;;  %v3154_v3 = vsub.f32 %v1525_v37, %v3146_v58 }
 0x1b0   :  { %v1054_v33 = vadd.f32 %v1053_v45, %v925_v55  ;;  %v3463_v5 = vand.u32 4294901760, %v3154_v3 }
 0x1b1   :  { %v1161_v44 = vpop.f32.mrf.mxu0 }
 0x1b2   :  { %1371 = vmatmul.f32.gmra.mxu2 %v2865_v24  ;;  %1460 = vmatmul.f32.gmra.mxu3 %v2873_v4  ;;  %v1152_v28 = vadd.f32 %v1151_v59, %v1054_v33  ;;  %v2230_v24 = vld [vmem:[%s3448_s0 + $0x68] sm:$0xff] }
 0x1b3   :  { %v1273_v38 = vpop.f32.mrf.mxu1  ;;  %v1528_v51 = vsel %vm63_vm0, %v2230_v24, 0 }
 0x1b4   :  { %1641 = vmatmul.f32.gmra.mxu0 %v1640_v27  ;;  %v3156_v45 = vadd.f32 %v1261_v22, %v1152_v28  ;;  %v1648_v27 = vand.u32 4294901760, %v1647_v8  ;;  %v3165_v37 = vand.u32 4294901760, %v1528_v51 }
 0x1b5   :  { %v932_v13 = vpop.f32.mrf.mxu2  ;;  %v1061_v55 = vpop.f32.mrf.mxu3 }
 0x1b6   :  { %v933_v59 = vadd.f32 %v2979_v26, %v932_v13  ;;  %1762 = vmatmul.f32.gmra.mxu1 %v3108_v49  ;;  %v1655_v13 = vsub.f32 %v3154_v3, %v3463_v5  ;;  %v3173_v24 = vsub.f32 %v1528_v51, %v3165_v37 }
 0x1b8   :  { %v1058_v33 = vadd.f32 %v1057_v6, %v933_v59  ;;  %3477 = vst [vmem:[#allocation3_spill] sm:$0xff] %v3173_v24  ;;  %v3466_v5 = vand.u32 4294901760, %v3173_v24 }
 0x1b9   :  { %v1166_v22 = vpop.f32.mrf.mxu0 }
 0x1ba   :  { %1375 = vmatmul.f32.gmra.mxu2 %v2873_v4  ;;  %1464 = vmatmul.f32.gmra.mxu3 %v2881_v15  ;;  %v1157_v28 = vadd.f32 %v1156_v53, %v1058_v33  ;;  %v2231_v4 = vld [vmem:[%s3448_s0 + $0x70] sm:$0xff] }
 0x1bb   :  { %v1279_v2 = vpop.f32.mrf.mxu1  ;;  %v1531_v47 = vsel %vm63_vm0, %v2231_v4, 0 }
 0x1bc   :  { %1649 = vmatmul.f32.gmra.mxu0 %v1648_v27  ;;  %v3175_v6 = vadd.f32 %v1267_v63, %v1157_v28  ;;  %v1656_v27 = vand.u32 4294901760, %v1655_v13  ;;  %v3184_v51 = vand.u32 4294901760, %v1531_v47 }
 0x1bd   :  { %v940_v8 = vpop.f32.mrf.mxu2  ;;  %v1065_v59 = vpop.f32.mrf.mxu3 }
 0x1be   :  { %v941_v53 = vadd.f32 %v2979_v26, %v940_v8  ;;  %1766 = vmatmul.f32.gmra.mxu1 %v3127_v56  ;;  %v1663_v8 = vsub.f32 %v3173_v24, %v3466_v5  ;;  %v3192_v4 = vsub.f32 %v1531_v47, %v3184_v51 }
 0x1c0   :  { %v1062_v33 = vadd.f32 %v1061_v55, %v941_v53  ;;  %v3472_v5 = vand.u32 4294901760, %v3192_v4 }
 0x1c1   :  { %v1171_v63 = vpop.f32.mrf.mxu0 }
 0x1c2   :  { %1379 = vmatmul.f32.gmra.mxu2 %v2881_v15  ;;  %1468 = vmatmul.f32.gmra.mxu3 %v2901_v19  ;;  %v1162_v28 = vadd.f32 %v1161_v44, %v1062_v33  ;;  %v2232_v15 = vld [vmem:[%s3448_s0 + $0x78] sm:$0xff] }
 0x1c3   :  { %v1285_v46 = vpop.f32.mrf.mxu1  ;;  %v1534_v43 = vsel %vm63_vm0, %v2232_v15, 0 }
 0x1c4   :  { %1657 = vmatmul.f32.gmra.mxu0 %v1656_v27  ;;  %v3194_v55 = vadd.f32 %v1273_v38, %v1162_v28  ;;  %v1664_v27 = vand.u32 4294901760, %v1663_v8  ;;  %v3203_v47 = vand.u32 4294901760, %v1534_v43 }
 0x1c5   :  { %v948_v13 = vpop.f32.mrf.mxu2  ;;  %v1069_v53 = vpop.f32.mrf.mxu3 }
 0x1c6   :  { %v949_v44 = vadd.f32 %v2979_v26, %v948_v13  ;;  %1770 = vmatmul.f32.gmra.mxu1 %v3146_v58  ;;  %v1671_v13 = vsub.f32 %v3192_v4, %v3472_v5  ;;  %v3211_v15 = vsub.f32 %v1534_v43, %v3203_v47 }
 0x1c8   :  { %v1066_v33 = vadd.f32 %v1065_v59, %v949_v44  ;;  %3478 = vst [vmem:[#allocation4_spill] sm:$0xff] %v3211_v15  ;;  %v1672_v58 = vand.u32 4294901760, %v1671_v13 }
 0x1c9   :  { %v1176_v38 = vpop.f32.mrf.mxu0 }
 0x1ca   :  { %1383 = vmatmul.f32.gmra.mxu2 %v2901_v19  ;;  %1472 = vmatmul.f32.gmra.mxu3 %v2913_v34  ;;  %v1167_v28 = vadd.f32 %v1166_v22, %v1066_v33  ;;  %v3473_v22 = vand.u32 4294901760, %v3211_v15 }
 0x1cb   :  { %v1291_v39 = vpop.f32.mrf.mxu1 }
 0x1cc   :  { %1665 = vmatmul.f32.gmra.mxu0 %v1664_v27  ;;  %v3213_v59 = vadd.f32 %v1279_v2, %v1167_v28  ;;  %v1679_v2 = vsub.f32 %v3211_v15, %v3473_v22 }
 0x1cd   :  { %v956_v8 = vpop.f32.mrf.mxu2  ;;  %v1073_v44 = vpop.f32.mrf.mxu3 }
 0x1ce   :  { %v957_v24 = vadd.f32 %v2979_v26, %v956_v8  ;;  %1774 = vmatmul.f32.gmra.mxu1 %v3165_v37  ;;  %v1680_v13 = vand.u32 4294901760, %v1679_v2 }
 0x1d0   :  { %v1070_v19 = vadd.f32 %v1069_v53, %v957_v24 }
 0x1d1   :  { %v1181_v33 = vpop.f32.mrf.mxu0 }
 0x1d2   :  { %1387 = vmatmul.f32.gmra.mxu2 %v2913_v34  ;;  %1476 = vmatmul.f32.gmra.mxu3 %v2927_v18  ;;  %v1172_v27 = vadd.f32 %v1171_v63, %v1070_v19 }
 0x1d3   :  { %v1297_v43 = vpop.f32.mrf.mxu1 }
 0x1d4   :  { %1673 = vmatmul.f32.gmra.mxu0 %v1672_v58  ;;  %v3223_v28 = vadd.f32 %v1285_v46, %v1172_v27 }
 0x1d5   :  { %v964_v8 = vpop.f32.mrf.mxu2  ;;  %v1077_v5 = vpop.f32.mrf.mxu3 }
 0x1d6   :  { %v965_v24 = vadd.f32 %v2979_v26, %v964_v8  ;;  %1778 = vmatmul.f32.gmra.mxu1 %v3184_v51 }
 0x1d8   :  { %v1074_v53 = vadd.f32 %v1073_v44, %v965_v24  ;;  %v3479_v44 = vand.u32 4294901760, %v2932_v31 }
 0x1d9   :  { %v1186_v34 = vpop.f32.mrf.mxu0 }
 0x1da   :  { %1391 = vmatmul.f32.gmra.mxu2 %v2927_v18  ;;  %1480 = vmatmul.f32.gmra.mxu3 %v2939_v17  ;;  %v1177_v58 = vadd.f32 %v1176_v38, %v1074_v53 }
 0x1db   :  { %v1303_v63 = vpop.f32.mrf.mxu1 }
 0x1dc   :  { %1681 = vmatmul.f32.gmra.mxu0 %v1680_v13  ;;  %v3229_v19 = vadd.f32 %v1291_v39, %v1177_v58 }
 0x1dd   :  { %v972_v46 = vpop.f32.mrf.mxu2  ;;  %v1081_v27 = vpop.f32.mrf.mxu3 }
 0x1de   :  { %v973_v22 = vadd.f32 %v2979_v26, %v972_v46  ;;  %1782 = vmatmul.f32.gmra.mxu1 %v3203_v47 }
 0x1e0   :  { %v1078_v8 = vadd.f32 %v1077_v5, %v973_v22 }
 0x1e1   :  { %v1562_v15 = vpop.f32.mrf.mxu0 }
 0x1e2   :  { %1395 = vmatmul.f32.gmra.mxu2 %v2939_v17  ;;  %1914 = vmatmul.f32.vlgmr.msra.gmra.mxu3 %v3479_v44  ;;  %v1182_v18 = vadd.f32 %v1181_v33, %v1078_v8  ;;  %v3480_v17 = vand.u32 4294901760, %v2950_v7 }
 0x1e3   :  { %v1723_v2 = vpop.f32.mrf.mxu1 }
 0x1e4   :  { %2037 = vmatmul.f32.vlgmr.msra.gmra.mxu0 %v2925_v32  ;;  %v3237_v38 = vadd.f32 %v1297_v43, %v1182_v18 }
 0x1e5   :  { %v980_v39 = vpop.f32.mrf.mxu2  ;;  %v1421_v24 = vpop.f32.mrf.mxu3 }
 0x1e6   :  { %v981_v53 = vadd.f32 %v2979_v26, %v980_v39  ;;  %2122 = vmatmul.f32.vlgmr.msra.gmra.mxu1 %v2925_v32 }
 0x1e8   :  { %v1082_v13 = vadd.f32 %v1081_v27, %v981_v53 }
 0x1e9   :  { %v1570_v5 = vpop.f32.mrf.mxu0 }
 0x1ea   :  { %1812 = vmatmul.f32.vlgmr.msra.gmra.mxu2 %v2932_v31  ;;  %1920 = vmatmul.f32.gmra.mxu3 %v3480_v17  ;;  %v1187_v22 = vadd.f32 %v1186_v34, %v1082_v13  ;;  %v3481_v31 = vand.u32 4294901760, %v2964_v60 }
 0x1eb   :  { %v1727_v33 = vpop.f32.mrf.mxu1 }
 0x1ec   :  { %2041 = vmatmul.f32.gmra.mxu0 %v2942_v35  ;;  %v3245_v58 = vadd.f32 %v1303_v63, %v1187_v22 }
 0x1ed   :  { %v1336_v43 = vpop.f32.mrf.mxu2  ;;  %v1425_v46 = vpop.f32.mrf.mxu3 }
 0x1ee   :  { %v1337_v8 = vadd.f32 %v1336_v43, %v3004_v25  ;;  %2126 = vmatmul.f32.gmra.mxu1 %v2942_v35 }
 0x1f0   :  { %v1422_v32 = vadd.f32 %v1421_v24, %v1337_v8 }
 0x1f1   :  { %v1578_v26 = vpop.f32.mrf.mxu0 }
 0x1f2   :  { %v1563_v27 = vadd.f32 %v1562_v15, %v1422_v32  ;;  %1817 = vmatmul.f32.gmra.mxu2 %v2950_v7  ;;  %1926 = vmatmul.f32.gmra.mxu3 %v3481_v31  ;;  %v3482_v7 = vand.u32 4294901760, %v2985_v0 }
 0x1f3   :  { %v1731_v34 = vpop.f32.mrf.mxu1 }
 0x1f4   :  { %v3252_v44 = vadd.f32 %v1723_v2, %v1563_v27  ;;  %2045 = vmatmul.f32.gmra.mxu0 %v2957_v42 }
 0x1f5   :  { %v1340_v63 = vpop.f32.mrf.mxu2  ;;  %v1429_v18 = vpop.f32.mrf.mxu3 }
 0x1f6   :  { %v1341_v39 = vadd.f32 %v1340_v63, %v3023_v21  ;;  %2130 = vmatmul.f32.gmra.mxu1 %v2957_v42 }
 0x1f8   :  { %v1426_v35 = vadd.f32 %v1425_v46, %v1341_v39 }
 0x1f9   :  { %v1586_v25 = vpop.f32.mrf.mxu0 }
 0x1fa   :  { %v1571_v24 = vadd.f32 %v1570_v5, %v1426_v35  ;;  %1822 = vmatmul.f32.gmra.mxu2 %v2964_v60  ;;  %1932 = vmatmul.f32.gmra.mxu3 %v3482_v7  ;;  %v3483_v60 = vand.u32 4294901760, %v3002_v41 }
 0x1fb   :  { %v1735_v15 = vpop.f32.mrf.mxu1 }
 0x1fc   :  { %v3260_v53 = vadd.f32 %v1727_v33, %v1571_v24  ;;  %2049 = vmatmul.f32.gmra.mxu0 %v2972_v11 }
 0x1fd   :  { %v1344_v2 = vpop.f32.mrf.mxu2  ;;  %v1433_v13 = vpop.f32.mrf.mxu3 }
 0x1fe   :  { %v1345_v17 = vadd.f32 %v1344_v2, %v3042_v14  ;;  %2134 = vmatmul.f32.gmra.mxu1 %v2972_v11 }
 0x200   :  { %v1430_v42 = vadd.f32 %v1429_v18, %v1345_v17 }
 0x201   :  { %v1594_v21 = vpop.f32.mrf.mxu0 }
 0x202   :  { %v1579_v22 = vadd.f32 %v1578_v26, %v1430_v42  ;;  %1827 = vmatmul.f32.gmra.mxu2 %v2985_v0  ;;  %1938 = vmatmul.f32.gmra.mxu3 %v3483_v60  ;;  %v3484_v0 = vand.u32 4294901760, %v3021_v1 }
 0x203   :  { %v1739_v5 = vpop.f32.mrf.mxu1 }
 0x204   :  { %v3268_v43 = vadd.f32 %v1731_v34, %v1579_v22  ;;  %2053 = vmatmul.f32.gmra.mxu0 %v2994_v30 }
 0x205   :  { %v1348_v33 = vpop.f32.mrf.mxu2  ;;  %v1437_v46 = vpop.f32.mrf.mxu3 }
 0x206   :  { %v1349_v8 = vadd.f32 %v1348_v33, %v3061_v54  ;;  %2138 = vmatmul.f32.gmra.mxu1 %v2994_v30 }
 0x208   :  { %v1434_v11 = vadd.f32 %v1433_v13, %v1349_v8 }
 0x209   :  { %v1602_v14 = vpop.f32.mrf.mxu0 }
 0x20a   :  { %v1587_v32 = vadd.f32 %v1586_v25, %v1434_v11  ;;  %1832 = vmatmul.f32.gmra.mxu2 %v3002_v41  ;;  %1944 = vmatmul.f32.gmra.mxu3 %v3484_v0  ;;  %v3485_v41 = vand.u32 4294901760, %v3040_v20 }
 0x20b   :  { %v1743_v26 = vpop.f32.mrf.mxu1 }
 0x20c   :  { %v3276_v27 = vadd.f32 %v1735_v15, %v1587_v32  ;;  %2057 = vmatmul.f32.gmra.mxu0 %v3013_v10 }
 0x20d   :  { %v1352_v31 = vpop.f32.mrf.mxu2  ;;  %v1441_v34 = vpop.f32.mrf.mxu3 }
 0x20e   :  { %v1353_v63 = vadd.f32 %v1352_v31, %v3080_v23  ;;  %2142 = vmatmul.f32.gmra.mxu1 %v3013_v10 }
 0x210   :  { %v1438_v30 = vadd.f32 %v1437_v46, %v1353_v63 }
 0x211   :  { %v1610_v54 = vpop.f32.mrf.mxu0 }
 0x212   :  { %v1595_v18 = vadd.f32 %v1594_v21, %v1438_v30  ;;  %1837 = vmatmul.f32.gmra.mxu2 %v3021_v1  ;;  %1950 = vmatmul.f32.gmra.mxu3 %v3485_v41  ;;  %v3486_v1 = vand.u32 4294901760, %v3059_v48 }
 0x213   :  { %v1747_v39 = vpop.f32.mrf.mxu1 }
 0x214   :  { %v3284_v35 = vadd.f32 %v1739_v5, %v1595_v18  ;;  %2061 = vmatmul.f32.gmra.mxu0 %v3032_v9 }
 0x215   :  { %v1356_v25 = vpop.f32.mrf.mxu2  ;;  %v1445_v24 = vpop.f32.mrf.mxu3 }
 0x216   :  { %v1357_v7 = vadd.f32 %v1356_v25, %v3099_v50  ;;  %2146 = vmatmul.f32.gmra.mxu1 %v3032_v9 }
 0x218   :  { %v1442_v10 = vadd.f32 %v1441_v34, %v1357_v7 }
 0x219   :  { %v1618_v23 = vpop.f32.mrf.mxu0 }
 0x21a   :  { %v1603_v15 = vadd.f32 %v1602_v14, %v1442_v10  ;;  %1842 = vmatmul.f32.gmra.mxu2 %v3040_v20  ;;  %1956 = vmatmul.f32.gmra.mxu3 %v3486_v1  ;;  %v3487_v20 = vand.u32 4294901760, %v3078_v62 }
 0x21b   :  { %v1751_v2 = vpop.f32.mrf.mxu1 }
 0x21c   :  { %v3292_v13 = vadd.f32 %v1743_v26, %v1603_v15  ;;  %2065 = vmatmul.f32.gmra.mxu0 %v3051_v57 }
 0x21d   :  { %v1360_v17 = vpop.f32.mrf.mxu2  ;;  %v1449_v42 = vpop.f32.mrf.mxu3 }
 0x21e   :  { %v1361_v21 = vadd.f32 %v1360_v17, %v3118_v40  ;;  %2150 = vmatmul.f32.gmra.mxu1 %v3051_v57  ;;  %v3492_v17 = vld [vmem:[#allocation2_spill] sm:$0xff] }
 0x220   :  { %v1446_v9 = vadd.f32 %v1445_v24, %v1361_v21 }
 0x221   :  { %v1626_v50 = vpop.f32.mrf.mxu0 }
 0x222   :  { %v1611_v22 = vadd.f32 %v1610_v54, %v1446_v9  ;;  %1847 = vmatmul.f32.gmra.mxu2 %v3059_v48  ;;  %1962 = vmatmul.f32.gmra.mxu3 %v3487_v20  ;;  %v3488_v48 = vand.u32 4294901760, %v3097_v61 }
 0x223   :  { %v1755_v60 = vpop.f32.mrf.mxu1 }
 0x224   :  { %v3300_v5 = vadd.f32 %v1747_v39, %v1611_v22  ;;  %2069 = vmatmul.f32.gmra.mxu0 %v3070_v12 }
 0x225   :  { %v1364_v33 = vpop.f32.mrf.mxu2  ;;  %v1453_v46 = vpop.f32.mrf.mxu3 }
 0x226   :  { %v1365_v8 = vadd.f32 %v1364_v33, %v3137_v16  ;;  %2154 = vmatmul.f32.gmra.mxu1 %v3070_v12 }
 0x228   :  { %v1450_v57 = vadd.f32 %v1449_v42, %v1365_v8 }
 0x229   :  { %v1634_v40 = vpop.f32.mrf.mxu0 }
 0x22a   :  { %v1619_v11 = vadd.f32 %v1618_v23, %v1450_v57  ;;  %1852 = vmatmul.f32.gmra.mxu2 %v3078_v62  ;;  %1968 = vmatmul.f32.gmra.mxu3 %v3488_v48  ;;  %v3489_v62 = vand.u32 4294901760, %v3116_v36 }
 0x22b   :  { %v1759_v14 = vpop.f32.mrf.mxu1 }
 0x22c   :  { %v3308_v32 = vadd.f32 %v1751_v2, %v1619_v11  ;;  %2073 = vmatmul.f32.gmra.mxu0 %v3089_v29 }
 0x22d   :  { %v1368_v0 = vpop.f32.mrf.mxu2  ;;  %v1457_v26 = vpop.f32.mrf.mxu3 }
 0x22e   :  { %v1369_v31 = vadd.f32 %v1368_v0, %v3156_v45  ;;  %2158 = vmatmul.f32.gmra.mxu1 %v3089_v29 }
 0x230   :  { %v1454_v12 = vadd.f32 %v1453_v46, %v1369_v31 }
 0x231   :  { %v1642_v16 = vpop.f32.mrf.mxu0 }
 0x232   :  { %v1627_v34 = vadd.f32 %v1626_v50, %v1454_v12  ;;  %1857 = vmatmul.f32.gmra.mxu2 %v3097_v61  ;;  %1974 = vmatmul.f32.gmra.mxu3 %v3489_v62  ;;  %v3490_v61 = vand.u32 4294901760, %v3135_v52  ;;  %v3496_v12 = vld [vmem:[#allocation4_spill] sm:$0xff] }
 0x233   :  { %v1763_v63 = vpop.f32.mrf.mxu1 }
 0x234   :  { %v3316_v30 = vadd.f32 %v1755_v60, %v1627_v34  ;;  %2077 = vmatmul.f32.gmra.mxu0 %v3108_v49 }
 0x235   :  { %v1372_v54 = vpop.f32.mrf.mxu2  ;;  %v1461_v18 = vpop.f32.mrf.mxu3 }
 0x236   :  { %v1373_v41 = vadd.f32 %v1372_v54, %v3175_v6  ;;  %2162 = vmatmul.f32.gmra.mxu1 %v3108_v49 }
 0x238   :  { %v1458_v29 = vadd.f32 %v1457_v26, %v1373_v41 }
 0x239   :  { %v1650_v45 = vpop.f32.mrf.mxu0 }
 0x23a   :  { %v1635_v39 = vadd.f32 %v1634_v40, %v1458_v29  ;;  %1862 = vmatmul.f32.gmra.mxu2 %v3116_v36  ;;  %1980 = vmatmul.f32.gmra.mxu3 %v3490_v61  ;;  %v3491_v36 = vand.u32 4294901760, %v3154_v3 }
 0x23b   :  { %v1767_v25 = vpop.f32.mrf.mxu1 }
 0x23c   :  { %v3324_v24 = vadd.f32 %v1759_v14, %v1635_v39  ;;  %2081 = vmatmul.f32.gmra.mxu0 %v3127_v56 }
 0x23d   :  { %v1376_v7 = vpop.f32.mrf.mxu2  ;;  %v1465_v10 = vpop.f32.mrf.mxu3 }
 0x23e   :  { %v1377_v23 = vadd.f32 %v1376_v7, %v3194_v55  ;;  %2166 = vmatmul.f32.gmra.mxu1 %v3127_v56 }
 0x240   :  { %v1462_v49 = vadd.f32 %v1461_v18, %v1377_v23 }
 0x241   :  { %v1658_v6 = vpop.f32.mrf.mxu0 }
 0x242   :  { %v1643_v15 = vadd.f32 %v1642_v16, %v1462_v49  ;;  %1867 = vmatmul.f32.gmra.mxu2 %v3135_v52  ;;  %1986 = vmatmul.f32.gmra.mxu3 %v3491_v36  ;;  %v3493_v52 = vld [vmem:[#allocation3_spill] sm:$0xff]  ;;  %v3497_v16 = vand.u32 4294901760, %v3496_v12 }
 0x243   :  { %v1771_v1 = vpop.f32.mrf.mxu1  ;;  %v3494_v22 = vand.u32 4294901760, %v3493_v52 }
 0x244   :  { %v3332_v2 = vadd.f32 %v1763_v63, %v1643_v15  ;;  %2085 = vmatmul.f32.gmra.mxu0 %v3492_v17 }
 0x245   :  { %v1380_v42 = vpop.f32.mrf.mxu2  ;;  %v1469_v21 = vpop.f32.mrf.mxu3 }
 0x246   :  { %v1381_v9 = vadd.f32 %v1380_v42, %v3213_v59  ;;  %2170 = vmatmul.f32.gmra.mxu1 %v3492_v17 }
 0x248   :  { %v1466_v56 = vadd.f32 %v1465_v10, %v1381_v9 }
 0x249   :  { %v1666_v55 = vpop.f32.mrf.mxu0 }
 0x24a   :  { %v1651_v50 = vadd.f32 %v1650_v45, %v1466_v56  ;;  %1872 = vmatmul.f32.gmra.mxu2 %v3154_v3  ;;  %1992 = vmatmul.f32.gmra.mxu3 %v3494_v22  ;;  %v3495_v3 = vand.u32 4294901760, %v3192_v4 }
 0x24b   :  { %v1775_v20 = vpop.f32.mrf.mxu1 }
 0x24c   :  { %v3340_v60 = vadd.f32 %v1767_v25, %v1651_v50  ;;  %2089 = vmatmul.f32.gmra.mxu0 %v3165_v37 }
 0x24d   :  { %v1384_v33 = vpop.f32.mrf.mxu2  ;;  %v1473_v46 = vpop.f32.mrf.mxu3 }
 0x24e   :  { %v1385_v8 = vadd.f32 %v1384_v33, %v3223_v28  ;;  %2174 = vmatmul.f32.gmra.mxu1 %v3165_v37 }
 0x250   :  { %v1470_v59 = vadd.f32 %v1469_v21, %v1385_v8 }
 0x251   :  { %v1674_v57 = vpop.f32.mrf.mxu0 }
 0x252   :  { %v1659_v40 = vadd.f32 %v1658_v6, %v1470_v59  ;;  %1877 = vmatmul.f32.gmra.mxu2 %v3493_v52  ;;  %1998 = vmatmul.f32.gmra.mxu3 %v3495_v3 }
 0x253   :  { %v1779_v11 = vpop.f32.mrf.mxu1 }
 0x254   :  { %v3348_v48 = vadd.f32 %v1771_v1, %v1659_v40  ;;  %2093 = vmatmul.f32.gmra.mxu0 %v3184_v51 }
 0x255   :  { %v1388_v14 = vpop.f32.mrf.mxu2  ;;  %v1477_v0 = vpop.f32.mrf.mxu3 }
 0x256   :  { %v1389_v26 = vadd.f32 %v1388_v14, %v3229_v19  ;;  %2178 = vmatmul.f32.gmra.mxu1 %v3184_v51 }
 0x258   :  { %v1474_v37 = vadd.f32 %v1473_v46, %v1389_v26 }
 0x259   :  { %v1682_v28 = vpop.f32.mrf.mxu0 }
 0x25a   :  { %v1667_v31 = vadd.f32 %v1666_v55, %v1474_v37  ;;  %1882 = vmatmul.f32.gmra.mxu2 %v3192_v4  ;;  %2004 = vmatmul.f32.gmra.mxu3 %v3497_v16 }
 0x25b   :  { %v1783_v34 = vpop.f32.mrf.mxu1 }
 0x25c   :  { %v3356_v62 = vadd.f32 %v1775_v20, %v1667_v31  ;;  %2097 = vmatmul.f32.gmra.mxu0 %v3203_v47 }
 0x25d   :  { %v1392_v63 = vpop.f32.mrf.mxu2  ;;  %v1481_v54 = vpop.f32.mrf.mxu3 }
 0x25e   :  { %v1393_v18 = vadd.f32 %v1392_v63, %v3237_v38  ;;  %2182 = vmatmul.f32.gmra.mxu1 %v3203_v47 }
 0x260   :  { %v1478_v51 = vadd.f32 %v1477_v0, %v1393_v18 }
 0x261   :  { %v2038_v19 = vpop.f32.mrf.mxu0 }
 0x262   :  { %v1675_v41 = vadd.f32 %v1674_v57, %v1478_v51  ;;  %1887 = vmatmul.f32.gmra.mxu2 %v3496_v12 }
 0x263   :  { %v2123_v4 = vpop.f32.mrf.mxu1 }
 0x264   :  { %v3362_v29 = vadd.f32 %v1779_v11, %v1675_v41 }
 0x265   :  { %v1396_v45 = vpop.f32.mrf.mxu2  ;;  %v1915_v39 = vpop.f32.mrf.mxu3 }
 0x266   :  { %v1397_v61 = vadd.f32 %v1396_v45, %v3245_v58 }
 0x268   :  { %v1482_v25 = vadd.f32 %v1481_v54, %v1397_v61 }
 0x269   :  { %v2042_v7 = vpop.f32.mrf.mxu0 }
 0x26a   :  { %v1683_v10 = vadd.f32 %v1682_v28, %v1482_v25 }
 0x26b   :  { %v2127_v23 = vpop.f32.mrf.mxu1 }
 0x26c   :  { %v3365_v49 = vadd.f32 %v1783_v34, %v1683_v10 }
 0x26d   :  { %v1813_v38 = vpop.f32.mrf.mxu2  ;;  %v1921_v47 = vpop.f32.mrf.mxu3 }
 0x26e   :  { %v1814_v6 = vadd.f32 %v1813_v38, %v3252_v44 }
 0x270   :  { %v1916_v15 = vadd.f32 %v1915_v39, %v1814_v6 }
 0x271   :  { %v2046_v36 = vpop.f32.mrf.mxu0 }
 0x272   :  { %v2039_v1 = vadd.f32 %v2038_v19, %v1916_v15 }
 0x273   :  { %v2131_v17 = vpop.f32.mrf.mxu1 }
 0x274   :  { %v2124_v42 = vadd.f32 %v2123_v4, %v2039_v1 }
 0x275   :  { %v1818_v21 = vpop.f32.mrf.mxu2  ;;  %v1927_v9 = vpop.f32.mrf.mxu3 }
 0x276   :  { %2187 = vst.msk [vmem:[%s3453_s6] sm:$0xff] %vm2186_vm1, %v2124_v42  ;;  %v1819_v58 = vadd.f32 %v1818_v21, %v3260_v53 }
 0x278   :  { %v1922_v56 = vadd.f32 %v1921_v47, %v1819_v58 }
 0x279   :  { %v2050_v55 = vpop.f32.mrf.mxu0 }
 0x27a   :  { %v2043_v50 = vadd.f32 %v2042_v7, %v1922_v56 }
 0x27b   :  { %v2135_v52 = vpop.f32.mrf.mxu1 }
 0x27c   :  { %v2128_v44 = vadd.f32 %v2127_v23, %v2043_v50 }
 0x27d   :  { %v1823_v22 = vpop.f32.mrf.mxu2  ;;  %v1933_v20 = vpop.f32.mrf.mxu3 }
 0x27e   :  { %2188 = vst.msk [vmem:[%s3453_s6 + $0x8] sm:$0xff] %vm2186_vm1, %v2128_v44  ;;  %v1824_v33 = vadd.f32 %v1823_v22, %v3268_v43 }
 0x280   :  { %v1928_v46 = vadd.f32 %v1927_v9, %v1824_v33 }
 0x281   :  { %v2054_v8 = vpop.f32.mrf.mxu0 }
 0x282   :  { %v2047_v59 = vadd.f32 %v2046_v36, %v1928_v46 }
 0x283   :  { %v2139_v57 = vpop.f32.mrf.mxu1 }
 0x284   :  { %v2132_v40 = vadd.f32 %v2131_v17, %v2047_v59 }
 0x285   :  { %v1828_v53 = vpop.f32.mrf.mxu2  ;;  %v1939_v3 = vpop.f32.mrf.mxu3 }
 0x286   :  { %2189 = vst.msk [vmem:[%s3453_s6 + $0x10] sm:$0xff] %vm2186_vm1, %v2132_v40  ;;  %v1829_v11 = vadd.f32 %v1828_v53, %v3276_v27 }
 0x288   :  { %v1934_v14 = vadd.f32 %v1933_v20, %v1829_v11 }
 0x289   :  { %v2058_v0 = vpop.f32.mrf.mxu0 }
 0x28a   :  { %v2051_v26 = vadd.f32 %v2050_v55, %v1934_v14 }
 0x28b   :  { %v2143_v37 = vpop.f32.mrf.mxu1 }
 0x28c   :  { %v2136_v28 = vadd.f32 %v2135_v52, %v2051_v26 }
 0x28d   :  { %v1833_v43 = vpop.f32.mrf.mxu2  ;;  %v1945_v31 = vpop.f32.mrf.mxu3 }
 0x28e   :  { %2190 = vst.msk [vmem:[%s3453_s6 + $0x18] sm:$0xff] %vm2186_vm1, %v2136_v28  ;;  %v1834_v12 = vadd.f32 %v1833_v43, %v3284_v35 }
 0x290   :  { %v1940_v16 = vadd.f32 %v1939_v3, %v1834_v12 }
 0x291   :  { %v2062_v34 = vpop.f32.mrf.mxu0 }
 0x292   :  { %v2055_v63 = vadd.f32 %v2054_v8, %v1940_v16 }
 0x293   :  { %v2147_v54 = vpop.f32.mrf.mxu1 }
 0x294   :  { %v2140_v18 = vadd.f32 %v2139_v57, %v2055_v63 }
 0x295   :  { %v1838_v27 = vpop.f32.mrf.mxu2  ;;  %v1951_v51 = vpop.f32.mrf.mxu3 }
 0x296   :  { %2191 = vst.msk [vmem:[%s3453_s6 + $0x20] sm:$0xff] %vm2186_vm1, %v2140_v18  ;;  %v1839_v19 = vadd.f32 %v1838_v27, %v3292_v13 }
 0x298   :  { %v1946_v41 = vadd.f32 %v1945_v31, %v1839_v19 }
 0x299   :  { %v2066_v4 = vpop.f32.mrf.mxu0 }
 0x29a   :  { %v2059_v45 = vadd.f32 %v2058_v0, %v1946_v41 }
 0x29b   :  { %v2151_v39 = vpop.f32.mrf.mxu1 }
 0x29c   :  { %v2144_v61 = vadd.f32 %v2143_v37, %v2059_v45 }
 0x29d   :  { %v1843_v35 = vpop.f32.mrf.mxu2  ;;  %v1957_v25 = vpop.f32.mrf.mxu3 }
 0x29e   :  { %2192 = vst.msk [vmem:[%s3453_s6 + $0x28] sm:$0xff] %vm2186_vm1, %v2144_v61  ;;  %v1844_v7 = vadd.f32 %v1843_v35, %v3300_v5 }
 0x2a0   :  { %v1952_v10 = vadd.f32 %v1951_v51, %v1844_v7 }
 0x2a1   :  { %v2070_v23 = vpop.f32.mrf.mxu0 }
 0x2a2   :  { %v2063_v38 = vadd.f32 %v2062_v34, %v1952_v10 }
 0x2a3   :  { %v2155_v47 = vpop.f32.mrf.mxu1 }
 0x2a4   :  { %v2148_v6 = vadd.f32 %v2147_v54, %v2063_v38 }
 0x2a5   :  { %v1848_v13 = vpop.f32.mrf.mxu2  ;;  %v1963_v15 = vpop.f32.mrf.mxu3 }
 0x2a6   :  { %2193 = vst.msk [vmem:[%s3453_s6 + $0x30] sm:$0xff] %vm2186_vm1, %v2148_v6  ;;  %v1849_v36 = vadd.f32 %v1848_v13, %v3308_v32 }
 0x2a8   :  { %v1958_v1 = vadd.f32 %v1957_v25, %v1849_v36 }
 0x2a9   :  { %v2074_v42 = vpop.f32.mrf.mxu0 }
 0x2aa   :  { %v2067_v17 = vadd.f32 %v2066_v4, %v1958_v1 }
 0x2ab   :  { %v2159_v9 = vpop.f32.mrf.mxu1 }
 0x2ac   :  { %v2152_v21 = vadd.f32 %v2151_v39, %v2067_v17 }
 0x2ad   :  { %v1853_v5 = vpop.f32.mrf.mxu2  ;;  %v1969_v58 = vpop.f32.mrf.mxu3 }
 0x2ae   :  { %2194 = vst.msk [vmem:[%s3453_s6 + $0x38] sm:$0xff] %vm2186_vm1, %v2152_v21  ;;  %v1854_v56 = vadd.f32 %v1853_v5, %v3316_v30 }
 0x2b0   :  { %v1964_v55 = vadd.f32 %v1963_v15, %v1854_v56 }
 0x2b1   :  { %v2078_v44 = vpop.f32.mrf.mxu0 }
 0x2b2   :  { %v2071_v50 = vadd.f32 %v2070_v23, %v1964_v55 }
 0x2b3   :  { %v2163_v33 = vpop.f32.mrf.mxu1 }
 0x2b4   :  { %v2156_v52 = vadd.f32 %v2155_v47, %v2071_v50 }
 0x2b5   :  { %v1858_v22 = vpop.f32.mrf.mxu2  ;;  %v1975_v32 = vpop.f32.mrf.mxu3 }
 0x2b6   :  { %2195 = vst.msk [vmem:[%s3453_s6 + $0x40] sm:$0xff] %vm2186_vm1, %v2156_v52  ;;  %v1859_v20 = vadd.f32 %v1858_v22, %v3324_v24 }
 0x2b8   :  { %v1970_v46 = vadd.f32 %v1969_v58, %v1859_v20 }
 0x2b9   :  { %v2082_v53 = vpop.f32.mrf.mxu0 }
 0x2ba   :  { %v2075_v8 = vadd.f32 %v2074_v42, %v1970_v46 }
 0x2bb   :  { %v2167_v11 = vpop.f32.mrf.mxu1 }
 0x2bc   :  { %v2160_v59 = vadd.f32 %v2159_v9, %v2075_v8 }
 0x2bd   :  { %v1863_v57 = vpop.f32.mrf.mxu2  ;;  %v1981_v40 = vpop.f32.mrf.mxu3 }
 0x2be   :  { %2196 = vst.msk [vmem:[%s3453_s6 + $0x48] sm:$0xff] %vm2186_vm1, %v2160_v59  ;;  %v1864_v30 = vadd.f32 %v1863_v57, %v3332_v2 }
 0x2c0   :  { %v1976_v3 = vadd.f32 %v1975_v32, %v1864_v30 }
 0x2c1   :  { %v2086_v43 = vpop.f32.mrf.mxu0 }
 0x2c2   :  { %v2079_v14 = vadd.f32 %v2078_v44, %v1976_v3 }
 0x2c3   :  { %v2171_v12 = vpop.f32.mrf.mxu1 }
 0x2c4   :  { %v2164_v0 = vadd.f32 %v2163_v33, %v2079_v14 }
 0x2c5   :  { %v1868_v26 = vpop.f32.mrf.mxu2  ;;  %v1987_v37 = vpop.f32.mrf.mxu3 }
 0x2c6   :  { %2197 = vst.msk [vmem:[%s3453_s6 + $0x50] sm:$0xff] %vm2186_vm1, %v2164_v0  ;;  %v1869_v24 = vadd.f32 %v1868_v26, %v3340_v60 }
 0x2c8   :  { %v1982_v28 = vadd.f32 %v1981_v40, %v1869_v24 }
 0x2c9   :  { %v2090_v27 = vpop.f32.mrf.mxu0 }
 0x2ca   :  { %v2083_v31 = vadd.f32 %v2082_v53, %v1982_v28 }
 0x2cb   :  { %v2175_v19 = vpop.f32.mrf.mxu1 }
 0x2cc   :  { %v2168_v16 = vadd.f32 %v2167_v11, %v2083_v31 }
 0x2cd   :  { %v1873_v2 = vpop.f32.mrf.mxu2  ;;  %v1993_v54 = vpop.f32.mrf.mxu3 }
 0x2ce   :  { %2198 = vst.msk [vmem:[%s3453_s6 + $0x58] sm:$0xff] %vm2186_vm1, %v2168_v16  ;;  %v1874_v34 = vadd.f32 %v1873_v2, %v3348_v48 }
 0x2d0   :  { %v1988_v63 = vadd.f32 %v1987_v37, %v1874_v34 }
 0x2d1   :  { %v2094_v48 = vpop.f32.mrf.mxu0 }
 0x2d2   :  { %v2087_v18 = vadd.f32 %v2086_v43, %v1988_v63 }
 0x2d3   :  { %v2179_v7 = vpop.f32.mrf.mxu1 }
 0x2d4   :  { %v2172_v51 = vadd.f32 %v2171_v12, %v2087_v18 }
 0x2d5   :  { %v1878_v60 = vpop.f32.mrf.mxu2  ;;  %v1999_v39 = vpop.f32.mrf.mxu3 }
 0x2d6   :  { %2199 = vst.msk [vmem:[%s3453_s6 + $0x60] sm:$0xff] %vm2186_vm1, %v2172_v51  ;;  %v1879_v41 = vadd.f32 %v1878_v60, %v3356_v62 }
 0x2d8   :  { %v1994_v4 = vadd.f32 %v1993_v54, %v1879_v41 }
 0x2d9   :  { %v2098_v13 = vpop.f32.mrf.mxu0 }
 0x2da   :  { %v2091_v45 = vadd.f32 %v2090_v27, %v1994_v4 }
 0x2db   :  { %v2183_v36 = vpop.f32.mrf.mxu1 }
 0x2dc   :  { %v2176_v61 = vadd.f32 %v2175_v19, %v2091_v45 }
 0x2dd   :  { %v1883_v35 = vpop.f32.mrf.mxu2  ;;  %v2005_v6 = vpop.f32.mrf.mxu3 }
 0x2de   :  { %2200 = vst.msk [vmem:[%s3453_s6 + $0x68] sm:$0xff] %vm2186_vm1, %v2176_v61  ;;  %v1884_v25 = vadd.f32 %v1883_v35, %v3362_v29 }
 0x2e0   :  { %v2000_v10 = vadd.f32 %v1999_v39, %v1884_v25 }
 0x2e2   :  { %v2095_v23 = vadd.f32 %v2094_v48, %v2000_v10 }
 0x2e4   :  { %v2180_v38 = vadd.f32 %v2179_v7, %v2095_v23 }
 0x2e5   :  { %v1888_v47 = vpop.f32.mrf.mxu2 }
 0x2e6   :  { %2201 = vst.msk [vmem:[%s3453_s6 + $0x70] sm:$0xff] %vm2186_vm1, %v2180_v38  ;;  %v1889_v62 = vadd.f32 %v1888_v47, %v3365_v49 }
 0x2e8   :  { %v2006_v15 = vadd.f32 %v2005_v6, %v1889_v62 }
 0x2ea   :  { %v2099_v1 = vadd.f32 %v2098_v13, %v2006_v15 }
 0x2ec   :  { %v2184_v17 = vadd.f32 %v2183_v36, %v2099_v1 }
 0x2ee   :  { %2202 = vst.msk [vmem:[%s3453_s6 + $0x78] sm:$0xff] %vm2186_vm1, %v2184_v17 }

</bundles_post_ra>
